<compile_context>
chip_gen: v6e
topology: v6e:2x2x1
jax: 0.10.0
libtpu: 0.0.40
codegen_flags: <defaults>
</compile_context>

<pallas_src>
import math
from functools import partial

import numpy as np
import jax
import jax.numpy as jnp
from jax.experimental import pallas as pl
from jax.experimental.pallas import tpu as pltpu

LN_EPS = 1e-5
NEG_INF = -1e30


# ----------------------------------------------------------------------------
# In-kernel helpers
# ----------------------------------------------------------------------------
def _layernorm(x, gamma, beta):
    # x: (T, D), gamma/beta: (1, D)
    mu = jnp.mean(x, axis=-1, keepdims=True)
    var = jnp.mean((x - mu) ** 2, axis=-1, keepdims=True)
    return (x - mu) * jax.lax.rsqrt(var + LN_EPS) * gamma + beta


def _mha(n_q, kv, mask, wq, bq, wkv, bkv, wo, bo, *, num_heads):
    """Multi-head attention with fused lane-dense projections and a bf16 MXU path.

    n_q:  (T, D) f32   query source (already layer-normed; scale folded into wq/bq)
    kv:   (S, D) f32   key/value source
    mask: (T, S) f32   >0 means masked
    wq:   (D, D)  bf16 (1/sqrt(dk) pre-folded)    bq:  (1, D)   f32 (pre-folded)
    wkv:  (D, 2D) bf16 (wk | wv)                  bkv: (1, 2D)  f32
    wo:   (D, D)  bf16                            bo:  (1, D)   f32
    """
    H = num_heads
    T, D = n_q.shape
    S = kv.shape[0]
    dk = D // H

    # Lane-dense fused projections (bf16 operands, f32 accumulation).
    q = jnp.dot(n_q.astype(jnp.bfloat16), wq,
                preferred_element_type=jnp.float32) + bq              # (T, D)
    kvp = jnp.dot(kv.astype(jnp.bfloat16), wkv,
                  preferred_element_type=jnp.float32) + bkv           # (S, 2D)

    q16 = q.astype(jnp.bfloat16)
    k16 = kvp[:, :D].astype(jnp.bfloat16)
    v16 = kvp[:, D:].astype(jnp.bfloat16)

    # Split heads onto a leading batch axis (static lane slices, no per-head matmuls).
    qh = jnp.stack([q16[:, h * dk:(h + 1) * dk] for h in range(H)], axis=0)  # (H,T,dk)
    kh = jnp.stack([k16[:, h * dk:(h + 1) * dk] for h in range(H)], axis=0)  # (H,S,dk)
    vh = jnp.stack([v16[:, h * dk:(h + 1) * dk] for h in range(H)], axis=0)  # (H,S,dk)

    # Head-batched scores (attention scale already folded into wq/bq).
    s = jnp.einsum('htk,hsk->hts', qh, kh,
                   preferred_element_type=jnp.float32)                # (H, T, S)
    s = jnp.where(mask[None, :, :] > 0, NEG_INF, s)

    m = jnp.max(s, axis=-1, keepdims=True)
    p = jnp.exp(s - m)
    denom = jnp.sum(p, axis=-1, keepdims=True)
    p = p * pl.reciprocal(denom, approx=True)

    ctx = jnp.einsum('hts,hsk->htk', p.astype(jnp.bfloat16), vh,
                     preferred_element_type=jnp.float32)              # (H, T, dk)

    # Concatenate heads along lanes; single (T,D)@(D,D) output projection (K = D).
    ctx2 = jnp.concatenate([ctx[h] for h in range(H)], axis=-1)       # (T, D)
    return jnp.dot(ctx2.astype(jnp.bfloat16), wo,
                   preferred_element_type=jnp.float32) + bo           # (T, D)


# ----------------------------------------------------------------------------
# Fused decoder-block kernel (all three residual stages, one launch, grid=(B,))
# ----------------------------------------------------------------------------
def decoder_block_kernel(
    y_ref, mem_ref, trg_mask_ref, src_mask_ref,
    ln0_g_ref, ln0_b_ref,
    wq1_ref, bq1_ref, wkv1_ref, bkv1_ref, wo1_ref, bo1_ref,
    ln1_g_ref, ln1_b_ref,
    wq2_ref, bq2_ref, wkv2_ref, bkv2_ref, wo2_ref, bo2_ref,
    ln2_g_ref, ln2_b_ref,
    w1_ref, b1_ref, w2_ref, b2_ref,
    o_ref, *, num_heads):
    y = y_ref[0]                 # (T, D) f32
    mem = mem_ref[0]             # (S, D) f32
    trg_mask = trg_mask_ref[0]   # (T, T)
    src_mask = src_mask_ref[0]   # (T, S)

    # residual 0: self attention on LayerNorm(y)
    n = _layernorm(y, ln0_g_ref[...], ln0_b_ref[...])
    y = y + _mha(n, n, trg_mask,
                 wq1_ref[...], bq1_ref[...], wkv1_ref[...], bkv1_ref[...],
                 wo1_ref[...], bo1_ref[...], num_heads=num_heads)

    # residual 1: cross attention (q from LayerNorm(y), k/v from raw memory)
    n = _layernorm(y, ln1_g_ref[...], ln1_b_ref[...])
    y = y + _mha(n, mem, src_mask,
                 wq2_ref[...], bq2_ref[...], wkv2_ref[...], bkv2_ref[...],
                 wo2_ref[...], bo2_ref[...], num_heads=num_heads)

    # residual 2: feed forward (bf16 matmuls, f32 accumulation)
    n = _layernorm(y, ln2_g_ref[...], ln2_b_ref[...])
    h = jnp.maximum(
        jnp.dot(n.astype(jnp.bfloat16), w1_ref[...],
                preferred_element_type=jnp.float32) + b1_ref[...], 0.0)
    y = y + (jnp.dot(h.astype(jnp.bfloat16), w2_ref[...],
                     preferred_element_type=jnp.float32) + b2_ref[...])

    o_ref[0] = y


# ----------------------------------------------------------------------------
# Wrapper: param re-layout / dtype cast (outside the kernel) + pallas_call
# ----------------------------------------------------------------------------
def _prep_attn(p, num_heads):
    """Fold the attention scale into wq/bq, stack wk|wv, cast weights to bf16."""
    D = p["wq"].shape[0]
    dk = D // num_heads
    scale = 1.0 / math.sqrt(dk)
    return dict(
        wq=(p["wq"] * scale).astype(jnp.bfloat16),
        bq=(p["bq"] * scale).reshape(1, D).astype(jnp.float32),
        wkv=jnp.concatenate([p["wk"], p["wv"]], axis=1).astype(jnp.bfloat16),
        bkv=jnp.concatenate([p["bk"], p["bv"]]).reshape(1, 2 * D).astype(jnp.float32),
        wo=p["wo"].astype(jnp.bfloat16),
        bo=p["bo"].reshape(1, D).astype(jnp.float32),
    )


def decoder_block_pallas(memory, src_mask, decoder_layer_input, trg_mask, params,
                         *, num_heads):
    B, T, D = decoder_layer_input.shape
    S = memory.shape[1]
    ff = params["ff"]
    F = ff["w1"].shape[1]

    a1 = _prep_attn(params["attn1"], num_heads)
    a2 = _prep_attn(params["attn2"], num_heads)

    def ln(v):
        return v.reshape(1, D).astype(jnp.float32)

    operands = [
        decoder_layer_input.astype(jnp.float32),          # y
        memory.astype(jnp.float32),                       # memory
        trg_mask.astype(jnp.float32),                     # trg_mask
        src_mask.astype(jnp.float32),                     # src_mask
        ln(params["ln0_g"]), ln(params["ln0_b"]),
        a1["wq"], a1["bq"], a1["wkv"], a1["bkv"], a1["wo"], a1["bo"],
        ln(params["ln1_g"]), ln(params["ln1_b"]),
        a2["wq"], a2["bq"], a2["wkv"], a2["bkv"], a2["wo"], a2["bo"],
        ln(params["ln2_g"]), ln(params["ln2_b"]),
        ff["w1"].astype(jnp.bfloat16), ff["b1"].reshape(1, F).astype(jnp.float32),
        ff["w2"].astype(jnp.bfloat16), ff["b2"].reshape(1, D).astype(jnp.float32),
    ]

    def _rep(shape):
        # replicated (parameter) spec: same full block for every grid step
        nd = len(shape)
        return pl.BlockSpec(shape, lambda i, _nd=nd: (0,) * _nd)

    attn_specs = [
        _rep((D, D)), _rep((1, D)),           # wq (scale folded), bq
        _rep((D, 2 * D)), _rep((1, 2 * D)),   # wkv, bkv
        _rep((D, D)), _rep((1, D)),           # wo, bo
    ]
    in_specs = [
        pl.BlockSpec((1, T, D), lambda i: (i, 0, 0)),   # y
        pl.BlockSpec((1, S, D), lambda i: (i, 0, 0)),   # memory
        pl.BlockSpec((1, T, T), lambda i: (i, 0, 0)),   # trg_mask
        pl.BlockSpec((1, T, S), lambda i: (i, 0, 0)),   # src_mask
        _rep((1, D)), _rep((1, D)),                     # ln0 gamma, beta
        *attn_specs,                                    # attn1
        _rep((1, D)), _rep((1, D)),                     # ln1 gamma, beta
        *attn_specs,                                    # attn2
        _rep((1, D)), _rep((1, D)),                     # ln2 gamma, beta
        _rep((D, F)), _rep((1, F)),                     # w1, b1
        _rep((F, D)), _rep((1, D)),                     # w2, b2
    ]

    # Explicit VMEM limit sized from the actual operands (double-buffered) + slack.
    operand_bytes = sum(int(np.prod(a.shape)) * a.dtype.itemsize for a in operands)
    vmem_limit = int(min(64 * 1024 * 1024, 2 * operand_bytes + 8 * 1024 * 1024))

    kernel = partial(decoder_block_kernel, num_heads=num_heads)

    return pl.pallas_call(
        kernel,
        out_shape=jax.ShapeDtypeStruct((B, T, D), jnp.float32),
        grid=(B,),
        in_specs=in_specs,
        out_specs=pl.BlockSpec((1, T, D), lambda i: (i, 0, 0)),
        compiler_params=pltpu.CompilerParams(
            dimension_semantics=("parallel",),
            vmem_limit_bytes=vmem_limit),
    )(*operands)


# ----------------------------------------------------------------------------
# Pure-JAX f32 reference (mirrors the PyTorch forward, dropout = identity)
# ----------------------------------------------------------------------------
def _ln_ref(x, g, b):
    mu = x.mean(-1, keepdims=True)
    var = ((x - mu) ** 2).mean(-1, keepdims=True)
    return (x - mu) / jnp.sqrt(var + LN_EPS) * g + b


def _mha_ref(q_in, kv_in, mask, p, H):
    B, T, D = q_in.shape
    S = kv_in.shape[1]
    dk = D // H
    q = (q_in @ p["wq"] + p["bq"]).reshape(B, T, H, dk).transpose(0, 2, 1, 3)
    k = (kv_in @ p["wk"] + p["bk"]).reshape(B, S, H, dk).transpose(0, 2, 1, 3)
    v = (kv_in @ p["wv"] + p["bv"]).reshape(B, S, H, dk).transpose(0, 2, 1, 3)
    s = jnp.einsum("bhtd,bhsd->bhts", q, k) / math.sqrt(dk)
    s = jnp.where(mask[:, None, :, :] > 0, -jnp.inf, s)
    a = jax.nn.softmax(s, axis=-1)
    ctx = jnp.einsum("bhts,bhsd->bhtd", a, v).transpose(0, 2, 1, 3).reshape(B, T, D)
    return ctx @ p["wo"] + p["bo"]


def decoder_block_ref(memory, src_mask, decoder_layer_input, trg_mask, params, *, num_heads):
    x, y = memory, decoder_layer_input
    n = _ln_ref(y, params["ln0_g"], params["ln0_b"])
    y = y + _mha_ref(n, n, trg_mask, params["attn1"], num_heads)
    n = _ln_ref(y, params["ln1_g"], params["ln1_b"])
    y = y + _mha_ref(n, x, src_mask, params["attn2"], num_heads)
    n = _ln_ref(y, params["ln2_g"], params["ln2_b"])
    h = jnp.maximum(n @ params["ff"]["w1"] + params["ff"]["b1"], 0.0)
    y = y + (h @ params["ff"]["w2"] + params["ff"]["b2"])
    return y


# ----------------------------------------------------------------------------
# Main
# ----------------------------------------------------------------------------
if __name__ == "__main__":
    # Lane/sublane-dense small shapes: D, F multiples of 128; T, S multiples of 8.
    B, T, S = 2, 8, 16          # batch, target seq, source (memory) seq
    H, D, D_FF = 4, 128, 256    # heads, d_embed, d_ff

    key = jax.random.PRNGKey(0)

    def init_linear(k, din, dout):
        kw, kb = jax.random.split(k)
        w = jax.random.normal(kw, (din, dout), jnp.float32) * (1.0 / math.sqrt(din))
        b = jax.random.normal(kb, (dout,), jnp.float32) * 0.02
        return w, b

    def init_attn(k):
        ks = jax.random.split(k, 4)
        wq, bq = init_linear(ks[0], D, D)
        wk, bk = init_linear(ks[1], D, D)
        wv, bv = init_linear(ks[2], D, D)
        wo, bo = init_linear(ks[3], D, D)
        return dict(wq=wq, bq=bq, wk=wk, bk=bk, wv=wv, bv=bv, wo=wo, bo=bo)

    keys = jax.random.split(key, 8)
    params = {
        "ln0_g": jnp.ones((D,), jnp.float32), "ln0_b": jnp.zeros((D,), jnp.float32),
        "ln1_g": jnp.ones((D,), jnp.float32), "ln1_b": jnp.zeros((D,), jnp.float32),
        "ln2_g": jnp.ones((D,), jnp.float32), "ln2_b": jnp.zeros((D,), jnp.float32),
        "attn1": init_attn(keys[0]),
        "attn2": init_attn(keys[1]),
    }
    w1, b1 = init_linear(keys[2], D, D_FF)
    w2, b2 = init_linear(keys[3], D_FF, D)
    params["ff"] = dict(w1=w1, b1=b1, w2=w2, b2=b2)

    memory = jax.random.normal(keys[4], (B, S, D), jnp.float32)
    dec_in = jax.random.normal(keys[5], (B, T, D), jnp.float32)
    # trg_mask: causal mask (>0 where masked, i.e. future positions)
    trg_mask = jnp.triu(jnp.ones((T, T), jnp.float32), k=1)
    trg_mask = jnp.broadcast_to(trg_mask, (B, T, T))
    # src_mask: no positions masked
    src_mask = jnp.zeros((B, T, S), jnp.float32)

    out = decoder_block_pallas(memory, src_mask, dec_in, trg_mask, params, num_heads=H)
    out = jax.block_until_ready(out)

    ref = decoder_block_ref(memory, src_mask, dec_in, trg_mask, params, num_heads=H)
    # Tolerance loosened: kernel matmuls run with bf16 operands (f32 accumulation).
    np.testing.assert_allclose(np.asarray(out), np.asarray(ref), rtol=5e-2, atol=5e-2)

    print("KERNEL_OK")
</pallas_src>

<mosaic_0001>
module attributes {stable_mosaic.version = 11 : i64} {
  func.func @decoder_block_kernel(%arg0: i32, %arg1: memref<1x8x128xf32, #tpu.memory_space<vmem>>, %arg2: memref<1x16x128xf32, #tpu.memory_space<vmem>>, %arg3: memref<1x8x8xf32, #tpu.memory_space<vmem>>, %arg4: memref<1x8x16xf32, #tpu.memory_space<vmem>>, %arg5: memref<1x128xf32, #tpu.memory_space<vmem>>, %arg6: memref<1x128xf32, #tpu.memory_space<vmem>>, %arg7: memref<128x128xbf16, #tpu.memory_space<vmem>>, %arg8: memref<1x128xf32, #tpu.memory_space<vmem>>, %arg9: memref<128x256xbf16, #tpu.memory_space<vmem>>, %arg10: memref<1x256xf32, #tpu.memory_space<vmem>>, %arg11: memref<128x128xbf16, #tpu.memory_space<vmem>>, %arg12: memref<1x128xf32, #tpu.memory_space<vmem>>, %arg13: memref<1x128xf32, #tpu.memory_space<vmem>>, %arg14: memref<1x128xf32, #tpu.memory_space<vmem>>, %arg15: memref<128x128xbf16, #tpu.memory_space<vmem>>, %arg16: memref<1x128xf32, #tpu.memory_space<vmem>>, %arg17: memref<128x256xbf16, #tpu.memory_space<vmem>>, %arg18: memref<1x256xf32, #tpu.memory_space<vmem>>, %arg19: memref<128x128xbf16, #tpu.memory_space<vmem>>, %arg20: memref<1x128xf32, #tpu.memory_space<vmem>>, %arg21: memref<1x128xf32, #tpu.memory_space<vmem>>, %arg22: memref<1x128xf32, #tpu.memory_space<vmem>>, %arg23: memref<128x256xbf16, #tpu.memory_space<vmem>>, %arg24: memref<1x256xf32, #tpu.memory_space<vmem>>, %arg25: memref<256x128xbf16, #tpu.memory_space<vmem>>, %arg26: memref<1x128xf32, #tpu.memory_space<vmem>>, %arg27: memref<1x8x128xf32, #tpu.memory_space<vmem>>) attributes {dimension_semantics = [#tpu.dimension_semantics<parallel>], iteration_bounds = array<i64: 2>, scalar_prefetch = 0 : i64, scratch_operands = 0 : i64, tpu.core_type = #tpu.core_type<tc>, window_params = [{transform_indices = @transform_0, window_bounds = array<i64: 1, 8, 128>}, {transform_indices = @transform_1, window_bounds = array<i64: 1, 16, 128>}, {transform_indices = @transform_2, window_bounds = array<i64: 1, 8, 8>}, {transform_indices = @transform_3, window_bounds = array<i64: 1, 8, 16>}, {pipeline_mode = #tpu.pipeline_mode<synchronous>, transform_indices = @transform_4, window_bounds = array<i64: 1, 128>}, {pipeline_mode = #tpu.pipeline_mode<synchronous>, transform_indices = @transform_5, window_bounds = array<i64: 1, 128>}, {pipeline_mode = #tpu.pipeline_mode<synchronous>, transform_indices = @transform_6, window_bounds = array<i64: 128, 128>}, {pipeline_mode = #tpu.pipeline_mode<synchronous>, transform_indices = @transform_7, window_bounds = array<i64: 1, 128>}, {pipeline_mode = #tpu.pipeline_mode<synchronous>, transform_indices = @transform_8, window_bounds = array<i64: 128, 256>}, {pipeline_mode = #tpu.pipeline_mode<synchronous>, transform_indices = @transform_9, window_bounds = array<i64: 1, 256>}, {pipeline_mode = #tpu.pipeline_mode<synchronous>, transform_indices = @transform_10, window_bounds = array<i64: 128, 128>}, {pipeline_mode = #tpu.pipeline_mode<synchronous>, transform_indices = @transform_11, window_bounds = array<i64: 1, 128>}, {pipeline_mode = #tpu.pipeline_mode<synchronous>, transform_indices = @transform_12, window_bounds = array<i64: 1, 128>}, {pipeline_mode = #tpu.pipeline_mode<synchronous>, transform_indices = @transform_13, window_bounds = array<i64: 1, 128>}, {pipeline_mode = #tpu.pipeline_mode<synchronous>, transform_indices = @transform_14, window_bounds = array<i64: 128, 128>}, {pipeline_mode = #tpu.pipeline_mode<synchronous>, transform_indices = @transform_15, window_bounds = array<i64: 1, 128>}, {pipeline_mode = #tpu.pipeline_mode<synchronous>, transform_indices = @transform_16, window_bounds = array<i64: 128, 256>}, {pipeline_mode = #tpu.pipeline_mode<synchronous>, transform_indices = @transform_17, window_bounds = array<i64: 1, 256>}, {pipeline_mode = #tpu.pipeline_mode<synchronous>, transform_indices = @transform_18, window_bounds = array<i64: 128, 128>}, {pipeline_mode = #tpu.pipeline_mode<synchronous>, transform_indices = @transform_19, window_bounds = array<i64: 1, 128>}, {pipeline_mode = #tpu.pipeline_mode<synchronous>, transform_indices = @transform_20, window_bounds = array<i64: 1, 128>}, {pipeline_mode = #tpu.pipeline_mode<synchronous>, transform_indices = @transform_21, window_bounds = array<i64: 1, 128>}, {pipeline_mode = #tpu.pipeline_mode<synchronous>, transform_indices = @transform_22, window_bounds = array<i64: 128, 256>}, {pipeline_mode = #tpu.pipeline_mode<synchronous>, transform_indices = @transform_23, window_bounds = array<i64: 1, 256>}, {pipeline_mode = #tpu.pipeline_mode<synchronous>, transform_indices = @transform_24, window_bounds = array<i64: 256, 128>}, {pipeline_mode = #tpu.pipeline_mode<synchronous>, transform_indices = @transform_25, window_bounds = array<i64: 1, 128>}, {transform_indices = @transform_26, window_bounds = array<i64: 1, 8, 128>}]} {
    %c0 = arith.constant 0 : index
    %c0_0 = arith.constant 0 : index
    %c0_1 = arith.constant 0 : index
    %0 = vector.load %arg1[%c0, %c0_0, %c0_1] : memref<1x8x128xf32, #tpu.memory_space<vmem>>, vector<1x8x128xf32>
    %1 = vector.shape_cast %0 : vector<1x8x128xf32> to vector<8x128xf32>
    %c0_2 = arith.constant 0 : index
    %c0_3 = arith.constant 0 : index
    %c0_4 = arith.constant 0 : index
    %2 = vector.load %arg2[%c0_2, %c0_3, %c0_4] : memref<1x16x128xf32, #tpu.memory_space<vmem>>, vector<1x16x128xf32>
    %3 = vector.shape_cast %2 : vector<1x16x128xf32> to vector<16x128xf32>
    %c0_5 = arith.constant 0 : index
    %c0_6 = arith.constant 0 : index
    %c0_7 = arith.constant 0 : index
    %4 = vector.load %arg3[%c0_5, %c0_6, %c0_7] : memref<1x8x8xf32, #tpu.memory_space<vmem>>, vector<1x8x8xf32>
    %5 = vector.shape_cast %4 : vector<1x8x8xf32> to vector<8x8xf32>
    %c0_8 = arith.constant 0 : index
    %c0_9 = arith.constant 0 : index
    %c0_10 = arith.constant 0 : index
    %6 = vector.load %arg4[%c0_8, %c0_9, %c0_10] : memref<1x8x16xf32, #tpu.memory_space<vmem>>, vector<1x8x16xf32>
    %7 = vector.shape_cast %6 : vector<1x8x16xf32> to vector<8x16xf32>
    %c0_11 = arith.constant 0 : index
    %c0_12 = arith.constant 0 : index
    %8 = vector.load %arg5[%c0_11, %c0_12] : memref<1x128xf32, #tpu.memory_space<vmem>>, vector<1x128xf32>
    %c0_13 = arith.constant 0 : index
    %c0_14 = arith.constant 0 : index
    %9 = vector.load %arg6[%c0_13, %c0_14] : memref<1x128xf32, #tpu.memory_space<vmem>>, vector<1x128xf32>
    %cst = arith.constant dense<0.000000e+00> : vector<8xf32>
    %10 = vector.multi_reduction <add>, %1, %cst [1] : vector<8x128xf32> to vector<8xf32>
    %11 = vector.shape_cast %10 : vector<8xf32> to vector<8x1xf32>
    %cst_15 = arith.constant 1.280000e+02 : f32
    %12 = vector.broadcast %cst_15 : f32 to vector<8x1xf32>
    %13 = arith.divf %11, %12 : vector<8x1xf32>
    %14 = vector.broadcast %13 : vector<8x1xf32> to vector<8x128xf32>
    %15 = arith.subf %1, %14 : vector<8x128xf32>
    %16 = arith.mulf %15, %15 : vector<8x128xf32>
    %cst_16 = arith.constant dense<0.000000e+00> : vector<8xf32>
    %17 = vector.multi_reduction <add>, %16, %cst_16 [1] : vector<8x128xf32> to vector<8xf32>
    %18 = vector.shape_cast %17 : vector<8xf32> to vector<8x1xf32>
    %cst_17 = arith.constant 1.280000e+02 : f32
    %19 = vector.broadcast %cst_17 : f32 to vector<8x1xf32>
    %20 = arith.divf %18, %19 : vector<8x1xf32>
    %21 = vector.broadcast %13 : vector<8x1xf32> to vector<8x128xf32>
    %22 = arith.subf %1, %21 : vector<8x128xf32>
    %cst_18 = arith.constant 9.99999974E-6 : f32
    %23 = vector.broadcast %cst_18 : f32 to vector<8x1xf32>
    %24 = arith.addf %20, %23 : vector<8x1xf32>
    %25 = math.rsqrt %24 : vector<8x1xf32>
    %26 = vector.broadcast %25 : vector<8x1xf32> to vector<8x128xf32>
    %27 = arith.mulf %22, %26 : vector<8x128xf32>
    %28 = vector.broadcast %8 : vector<1x128xf32> to vector<8x128xf32>
    %29 = arith.mulf %27, %28 : vector<8x128xf32>
    %30 = vector.broadcast %9 : vector<1x128xf32> to vector<8x128xf32>
    %31 = arith.addf %29, %30 : vector<8x128xf32>
    %c0_19 = arith.constant 0 : index
    %c0_20 = arith.constant 0 : index
    %32 = vector.load %arg7[%c0_19, %c0_20] : memref<128x128xbf16, #tpu.memory_space<vmem>>, vector<128x128xbf16>
    %c0_21 = arith.constant 0 : index
    %c0_22 = arith.constant 0 : index
    %33 = vector.load %arg8[%c0_21, %c0_22] : memref<1x128xf32, #tpu.memory_space<vmem>>, vector<1x128xf32>
    %c0_23 = arith.constant 0 : index
    %c0_24 = arith.constant 0 : index
    %34 = vector.load %arg9[%c0_23, %c0_24] : memref<128x256xbf16, #tpu.memory_space<vmem>>, vector<128x256xbf16>
    %c0_25 = arith.constant 0 : index
    %c0_26 = arith.constant 0 : index
    %35 = vector.load %arg10[%c0_25, %c0_26] : memref<1x256xf32, #tpu.memory_space<vmem>>, vector<1x256xf32>
    %c0_27 = arith.constant 0 : index
    %c0_28 = arith.constant 0 : index
    %36 = vector.load %arg11[%c0_27, %c0_28] : memref<128x128xbf16, #tpu.memory_space<vmem>>, vector<128x128xbf16>
    %c0_29 = arith.constant 0 : index
    %c0_30 = arith.constant 0 : index
    %37 = vector.load %arg12[%c0_29, %c0_30] : memref<1x128xf32, #tpu.memory_space<vmem>>, vector<1x128xf32>
    %38 = arith.truncf %31 : vector<8x128xf32> to vector<8x128xbf16>
    %cst_31 = arith.constant dense<0.000000e+00> : vector<8x128xf32>
    %39 = tpu.matmul %38, %32, %cst_31 {dimension_numbers = #tpu.dot_dimension_numbers<[1], [0], [0], [1], [0, 0, 1, 1], [], []>} : vector<8x128xbf16>, vector<128x128xbf16>, vector<8x128xf32> -> vector<8x128xf32>
    %40 = vector.broadcast %33 : vector<1x128xf32> to vector<8x128xf32>
    %41 = arith.addf %39, %40 : vector<8x128xf32>
    %42 = arith.truncf %31 : vector<8x128xf32> to vector<8x128xbf16>
    %cst_32 = arith.constant dense<0.000000e+00> : vector<8x256xf32>
    %43 = tpu.matmul %42, %34, %cst_32 {dimension_numbers = #tpu.dot_dimension_numbers<[1], [0], [0], [1], [0, 0, 1, 1], [], []>} : vector<8x128xbf16>, vector<128x256xbf16>, vector<8x256xf32> -> vector<8x256xf32>
    %44 = vector.broadcast %35 : vector<1x256xf32> to vector<8x256xf32>
    %45 = arith.addf %43, %44 : vector<8x256xf32>
    %46 = arith.truncf %41 : vector<8x128xf32> to vector<8x128xbf16>
    %47 = vector.extract_strided_slice %45 {offsets = [0, 0], sizes = [8, 128], strides = [1, 1]} : vector<8x256xf32> to vector<8x128xf32>
    %48 = arith.truncf %47 : vector<8x128xf32> to vector<8x128xbf16>
    %49 = vector.extract_strided_slice %45 {offsets = [0, 128], sizes = [8, 128], strides = [1, 1]} : vector<8x256xf32> to vector<8x128xf32>
    %50 = arith.truncf %49 : vector<8x128xf32> to vector<8x128xbf16>
    %51 = vector.extract_strided_slice %46 {offsets = [0, 0], sizes = [8, 32], strides = [1, 1]} : vector<8x128xbf16> to vector<8x32xbf16>
    %52 = vector.extract_strided_slice %46 {offsets = [0, 32], sizes = [8, 32], strides = [1, 1]} : vector<8x128xbf16> to vector<8x32xbf16>
    %53 = vector.extract_strided_slice %46 {offsets = [0, 64], sizes = [8, 32], strides = [1, 1]} : vector<8x128xbf16> to vector<8x32xbf16>
    %54 = vector.extract_strided_slice %46 {offsets = [0, 96], sizes = [8, 32], strides = [1, 1]} : vector<8x128xbf16> to vector<8x32xbf16>
    %55 = vector.shape_cast %51 : vector<8x32xbf16> to vector<1x8x32xbf16>
    %56 = vector.shape_cast %52 : vector<8x32xbf16> to vector<1x8x32xbf16>
    %57 = vector.shape_cast %53 : vector<8x32xbf16> to vector<1x8x32xbf16>
    %58 = vector.shape_cast %54 : vector<8x32xbf16> to vector<1x8x32xbf16>
    %59 = tpu.concatenate %55, %56, %57, %58 in 0 : vector<1x8x32xbf16>, vector<1x8x32xbf16>, vector<1x8x32xbf16>, vector<1x8x32xbf16> -> vector<4x8x32xbf16>
    %60 = vector.extract_strided_slice %48 {offsets = [0, 0], sizes = [8, 32], strides = [1, 1]} : vector<8x128xbf16> to vector<8x32xbf16>
    %61 = vector.extract_strided_slice %48 {offsets = [0, 32], sizes = [8, 32], strides = [1, 1]} : vector<8x128xbf16> to vector<8x32xbf16>
    %62 = vector.extract_strided_slice %48 {offsets = [0, 64], sizes = [8, 32], strides = [1, 1]} : vector<8x128xbf16> to vector<8x32xbf16>
    %63 = vector.extract_strided_slice %48 {offsets = [0, 96], sizes = [8, 32], strides = [1, 1]} : vector<8x128xbf16> to vector<8x32xbf16>
    %64 = vector.shape_cast %60 : vector<8x32xbf16> to vector<1x8x32xbf16>
    %65 = vector.shape_cast %61 : vector<8x32xbf16> to vector<1x8x32xbf16>
    %66 = vector.shape_cast %62 : vector<8x32xbf16> to vector<1x8x32xbf16>
    %67 = vector.shape_cast %63 : vector<8x32xbf16> to vector<1x8x32xbf16>
    %68 = tpu.concatenate %64, %65, %66, %67 in 0 : vector<1x8x32xbf16>, vector<1x8x32xbf16>, vector<1x8x32xbf16>, vector<1x8x32xbf16> -> vector<4x8x32xbf16>
    %69 = vector.extract_strided_slice %50 {offsets = [0, 0], sizes = [8, 32], strides = [1, 1]} : vector<8x128xbf16> to vector<8x32xbf16>
    %70 = vector.extract_strided_slice %50 {offsets = [0, 32], sizes = [8, 32], strides = [1, 1]} : vector<8x128xbf16> to vector<8x32xbf16>
    %71 = vector.extract_strided_slice %50 {offsets = [0, 64], sizes = [8, 32], strides = [1, 1]} : vector<8x128xbf16> to vector<8x32xbf16>
    %72 = vector.extract_strided_slice %50 {offsets = [0, 96], sizes = [8, 32], strides = [1, 1]} : vector<8x128xbf16> to vector<8x32xbf16>
    %73 = vector.shape_cast %69 : vector<8x32xbf16> to vector<1x8x32xbf16>
    %74 = vector.shape_cast %70 : vector<8x32xbf16> to vector<1x8x32xbf16>
    %75 = vector.shape_cast %71 : vector<8x32xbf16> to vector<1x8x32xbf16>
    %76 = vector.shape_cast %72 : vector<8x32xbf16> to vector<1x8x32xbf16>
    %77 = tpu.concatenate %73, %74, %75, %76 in 0 : vector<1x8x32xbf16>, vector<1x8x32xbf16>, vector<1x8x32xbf16>, vector<1x8x32xbf16> -> vector<4x8x32xbf16>
    "tpu.trace_start"() <{level = 10 : i32, message = "htk,hsk->hts"}> : () -> ()
    %cst_33 = arith.constant dense<0.000000e+00> : vector<4x8x8xf32>
    %78 = tpu.matmul %59, %68, %cst_33 {dimension_numbers = #tpu.dot_dimension_numbers<[2], [2], [1], [1], [0, 0, 0, 1, 1, 1], [0], [0]>} : vector<4x8x32xbf16>, vector<4x8x32xbf16>, vector<4x8x8xf32> -> vector<4x8x8xf32>
    "tpu.trace_stop"() : () -> ()
    %79 = vector.shape_cast %5 : vector<8x8xf32> to vector<1x8x8xf32>
    %cst_34 = arith.constant 0.000000e+00 : f32
    %80 = vector.broadcast %cst_34 : f32 to vector<1x8x8xf32>
    %81 = arith.cmpf ogt, %79, %80 : vector<1x8x8xf32>
    %cst_35 = arith.constant -1.000000e+30 : f32
    %82 = vector.shape_cast %81 : vector<1x8x8xi1> to vector<1x8x8xi1>
    %83 = vector.broadcast %82 : vector<1x8x8xi1> to vector<4x8x8xi1>
    %84 = vector.broadcast %cst_35 : f32 to vector<4x8x8xf32>
    %85 = arith.select %83, %84, %78 : vector<4x8x8xi1>, vector<4x8x8xf32>
    %cst_36 = arith.constant dense<0xFF800000> : vector<4x8xf32>
    %86 = vector.multi_reduction <maximumf>, %85, %cst_36 [2] : vector<4x8x8xf32> to vector<4x8xf32>
    %87 = vector.shape_cast %86 : vector<4x8xf32> to vector<4x8x1xf32>
    %88 = vector.broadcast %87 : vector<4x8x1xf32> to vector<4x8x8xf32>
    %89 = arith.subf %85, %88 : vector<4x8x8xf32>
    %90 = math.exp %89 : vector<4x8x8xf32>
    %cst_37 = arith.constant dense<0.000000e+00> : vector<4x8xf32>
    %91 = vector.multi_reduction <add>, %90, %cst_37 [2] : vector<4x8x8xf32> to vector<4x8xf32>
    %92 = vector.shape_cast %91 : vector<4x8xf32> to vector<4x8x1xf32>
    %93 = tpu.reciprocal %92 {approx = true} : vector<4x8x1xf32> -> vector<4x8x1xf32>
    %94 = vector.broadcast %93 : vector<4x8x1xf32> to vector<4x8x8xf32>
    %95 = arith.mulf %90, %94 : vector<4x8x8xf32>
    %96 = arith.truncf %95 : vector<4x8x8xf32> to vector<4x8x8xbf16>
    "tpu.trace_start"() <{level = 10 : i32, message = "hts,hsk->htk"}> : () -> ()
    %cst_38 = arith.constant dense<0.000000e+00> : vector<4x8x32xf32>
    %97 = tpu.matmul %96, %77, %cst_38 {dimension_numbers = #tpu.dot_dimension_numbers<[2], [1], [1], [2], [0, 0, 0, 1, 1, 2], [0], [0]>} : vector<4x8x8xbf16>, vector<4x8x32xbf16>, vector<4x8x32xf32> -> vector<4x8x32xf32>
    "tpu.trace_stop"() : () -> ()
    %98 = vector.extract_strided_slice %97 {offsets = [0, 0, 0], sizes = [1, 8, 32], strides = [1, 1, 1]} : vector<4x8x32xf32> to vector<1x8x32xf32>
    %99 = vector.shape_cast %98 : vector<1x8x32xf32> to vector<8x32xf32>
    %100 = vector.extract_strided_slice %97 {offsets = [1, 0, 0], sizes = [1, 8, 32], strides = [1, 1, 1]} : vector<4x8x32xf32> to vector<1x8x32xf32>
    %101 = vector.shape_cast %100 : vector<1x8x32xf32> to vector<8x32xf32>
    %102 = vector.extract_strided_slice %97 {offsets = [2, 0, 0], sizes = [1, 8, 32], strides = [1, 1, 1]} : vector<4x8x32xf32> to vector<1x8x32xf32>
    %103 = vector.shape_cast %102 : vector<1x8x32xf32> to vector<8x32xf32>
    %104 = vector.extract_strided_slice %97 {offsets = [3, 0, 0], sizes = [1, 8, 32], strides = [1, 1, 1]} : vector<4x8x32xf32> to vector<1x8x32xf32>
    %105 = vector.shape_cast %104 : vector<1x8x32xf32> to vector<8x32xf32>
    %106 = tpu.concatenate %99, %101, %103, %105 in 1 : vector<8x32xf32>, vector<8x32xf32>, vector<8x32xf32>, vector<8x32xf32> -> vector<8x128xf32>
    %107 = arith.truncf %106 : vector<8x128xf32> to vector<8x128xbf16>
    %cst_39 = arith.constant dense<0.000000e+00> : vector<8x128xf32>
    %108 = tpu.matmul %107, %36, %cst_39 {dimension_numbers = #tpu.dot_dimension_numbers<[1], [0], [0], [1], [0, 0, 1, 1], [], []>} : vector<8x128xbf16>, vector<128x128xbf16>, vector<8x128xf32> -> vector<8x128xf32>
    %109 = vector.broadcast %37 : vector<1x128xf32> to vector<8x128xf32>
    %110 = arith.addf %108, %109 : vector<8x128xf32>
    %111 = arith.addf %1, %110 : vector<8x128xf32>
    %c0_40 = arith.constant 0 : index
    %c0_41 = arith.constant 0 : index
    %112 = vector.load %arg13[%c0_40, %c0_41] : memref<1x128xf32, #tpu.memory_space<vmem>>, vector<1x128xf32>
    %c0_42 = arith.constant 0 : index
    %c0_43 = arith.constant 0 : index
    %113 = vector.load %arg14[%c0_42, %c0_43] : memref<1x128xf32, #tpu.memory_space<vmem>>, vector<1x128xf32>
    %cst_44 = arith.constant dense<0.000000e+00> : vector<8xf32>
    %114 = vector.multi_reduction <add>, %111, %cst_44 [1] : vector<8x128xf32> to vector<8xf32>
    %115 = vector.shape_cast %114 : vector<8xf32> to vector<8x1xf32>
    %cst_45 = arith.constant 1.280000e+02 : f32
    %116 = vector.broadcast %cst_45 : f32 to vector<8x1xf32>
    %117 = arith.divf %115, %116 : vector<8x1xf32>
    %118 = vector.broadcast %117 : vector<8x1xf32> to vector<8x128xf32>
    %119 = arith.subf %111, %118 : vector<8x128xf32>
    %120 = arith.mulf %119, %119 : vector<8x128xf32>
    %cst_46 = arith.constant dense<0.000000e+00> : vector<8xf32>
    %121 = vector.multi_reduction <add>, %120, %cst_46 [1] : vector<8x128xf32> to vector<8xf32>
    %122 = vector.shape_cast %121 : vector<8xf32> to vector<8x1xf32>
    %cst_47 = arith.constant 1.280000e+02 : f32
    %123 = vector.broadcast %cst_47 : f32 to vector<8x1xf32>
    %124 = arith.divf %122, %123 : vector<8x1xf32>
    %125 = vector.broadcast %117 : vector<8x1xf32> to vector<8x128xf32>
    %126 = arith.subf %111, %125 : vector<8x128xf32>
    %cst_48 = arith.constant 9.99999974E-6 : f32
    %127 = vector.broadcast %cst_48 : f32 to vector<8x1xf32>
    %128 = arith.addf %124, %127 : vector<8x1xf32>
    %129 = math.rsqrt %128 : vector<8x1xf32>
    %130 = vector.broadcast %129 : vector<8x1xf32> to vector<8x128xf32>
    %131 = arith.mulf %126, %130 : vector<8x128xf32>
    %132 = vector.broadcast %112 : vector<1x128xf32> to vector<8x128xf32>
    %133 = arith.mulf %131, %132 : vector<8x128xf32>
    %134 = vector.broadcast %113 : vector<1x128xf32> to vector<8x128xf32>
    %135 = arith.addf %133, %134 : vector<8x128xf32>
    %c0_49 = arith.constant 0 : index
    %c0_50 = arith.constant 0 : index
    %136 = vector.load %arg15[%c0_49, %c0_50] : memref<128x128xbf16, #tpu.memory_space<vmem>>, vector<128x128xbf16>
    %c0_51 = arith.constant 0 : index
    %c0_52 = arith.constant 0 : index
    %137 = vector.load %arg16[%c0_51, %c0_52] : memref<1x128xf32, #tpu.memory_space<vmem>>, vector<1x128xf32>
    %c0_53 = arith.constant 0 : index
    %c0_54 = arith.constant 0 : index
    %138 = vector.load %arg17[%c0_53, %c0_54] : memref<128x256xbf16, #tpu.memory_space<vmem>>, vector<128x256xbf16>
    %c0_55 = arith.constant 0 : index
    %c0_56 = arith.constant 0 : index
    %139 = vector.load %arg18[%c0_55, %c0_56] : memref<1x256xf32, #tpu.memory_space<vmem>>, vector<1x256xf32>
    %c0_57 = arith.constant 0 : index
    %c0_58 = arith.constant 0 : index
    %140 = vector.load %arg19[%c0_57, %c0_58] : memref<128x128xbf16, #tpu.memory_space<vmem>>, vector<128x128xbf16>
    %c0_59 = arith.constant 0 : index
    %c0_60 = arith.constant 0 : index
    %141 = vector.load %arg20[%c0_59, %c0_60] : memref<1x128xf32, #tpu.memory_space<vmem>>, vector<1x128xf32>
    %142 = arith.truncf %135 : vector<8x128xf32> to vector<8x128xbf16>
    %cst_61 = arith.constant dense<0.000000e+00> : vector<8x128xf32>
    %143 = tpu.matmul %142, %136, %cst_61 {dimension_numbers = #tpu.dot_dimension_numbers<[1], [0], [0], [1], [0, 0, 1, 1], [], []>} : vector<8x128xbf16>, vector<128x128xbf16>, vector<8x128xf32> -> vector<8x128xf32>
    %144 = vector.broadcast %137 : vector<1x128xf32> to vector<8x128xf32>
    %145 = arith.addf %143, %144 : vector<8x128xf32>
    %146 = arith.truncf %3 : vector<16x128xf32> to vector<16x128xbf16>
    %cst_62 = arith.constant dense<0.000000e+00> : vector<16x256xf32>
    %147 = tpu.matmul %146, %138, %cst_62 {dimension_numbers = #tpu.dot_dimension_numbers<[1], [0], [0], [1], [0, 0, 1, 1], [], []>} : vector<16x128xbf16>, vector<128x256xbf16>, vector<16x256xf32> -> vector<16x256xf32>
    %148 = vector.broadcast %139 : vector<1x256xf32> to vector<16x256xf32>
    %149 = arith.addf %147, %148 : vector<16x256xf32>
    %150 = arith.truncf %145 : vector<8x128xf32> to vector<8x128xbf16>
    %151 = vector.extract_strided_slice %149 {offsets = [0, 0], sizes = [16, 128], strides = [1, 1]} : vector<16x256xf32> to vector<16x128xf32>
    %152 = arith.truncf %151 : vector<16x128xf32> to vector<16x128xbf16>
    %153 = vector.extract_strided_slice %149 {offsets = [0, 128], sizes = [16, 128], strides = [1, 1]} : vector<16x256xf32> to vector<16x128xf32>
    %154 = arith.truncf %153 : vector<16x128xf32> to vector<16x128xbf16>
    %155 = vector.extract_strided_slice %150 {offsets = [0, 0], sizes = [8, 32], strides = [1, 1]} : vector<8x128xbf16> to vector<8x32xbf16>
    %156 = vector.extract_strided_slice %150 {offsets = [0, 32], sizes = [8, 32], strides = [1, 1]} : vector<8x128xbf16> to vector<8x32xbf16>
    %157 = vector.extract_strided_slice %150 {offsets = [0, 64], sizes = [8, 32], strides = [1, 1]} : vector<8x128xbf16> to vector<8x32xbf16>
    %158 = vector.extract_strided_slice %150 {offsets = [0, 96], sizes = [8, 32], strides = [1, 1]} : vector<8x128xbf16> to vector<8x32xbf16>
    %159 = vector.shape_cast %155 : vector<8x32xbf16> to vector<1x8x32xbf16>
    %160 = vector.shape_cast %156 : vector<8x32xbf16> to vector<1x8x32xbf16>
    %161 = vector.shape_cast %157 : vector<8x32xbf16> to vector<1x8x32xbf16>
    %162 = vector.shape_cast %158 : vector<8x32xbf16> to vector<1x8x32xbf16>
    %163 = tpu.concatenate %159, %160, %161, %162 in 0 : vector<1x8x32xbf16>, vector<1x8x32xbf16>, vector<1x8x32xbf16>, vector<1x8x32xbf16> -> vector<4x8x32xbf16>
    %164 = vector.extract_strided_slice %152 {offsets = [0, 0], sizes = [16, 32], strides = [1, 1]} : vector<16x128xbf16> to vector<16x32xbf16>
    %165 = vector.extract_strided_slice %152 {offsets = [0, 32], sizes = [16, 32], strides = [1, 1]} : vector<16x128xbf16> to vector<16x32xbf16>
    %166 = vector.extract_strided_slice %152 {offsets = [0, 64], sizes = [16, 32], strides = [1, 1]} : vector<16x128xbf16> to vector<16x32xbf16>
    %167 = vector.extract_strided_slice %152 {offsets = [0, 96], sizes = [16, 32], strides = [1, 1]} : vector<16x128xbf16> to vector<16x32xbf16>
    %168 = vector.shape_cast %164 : vector<16x32xbf16> to vector<1x16x32xbf16>
    %169 = vector.shape_cast %165 : vector<16x32xbf16> to vector<1x16x32xbf16>
    %170 = vector.shape_cast %166 : vector<16x32xbf16> to vector<1x16x32xbf16>
    %171 = vector.shape_cast %167 : vector<16x32xbf16> to vector<1x16x32xbf16>
    %172 = tpu.concatenate %168, %169, %170, %171 in 0 : vector<1x16x32xbf16>, vector<1x16x32xbf16>, vector<1x16x32xbf16>, vector<1x16x32xbf16> -> vector<4x16x32xbf16>
    %173 = vector.extract_strided_slice %154 {offsets = [0, 0], sizes = [16, 32], strides = [1, 1]} : vector<16x128xbf16> to vector<16x32xbf16>
    %174 = vector.extract_strided_slice %154 {offsets = [0, 32], sizes = [16, 32], strides = [1, 1]} : vector<16x128xbf16> to vector<16x32xbf16>
    %175 = vector.extract_strided_slice %154 {offsets = [0, 64], sizes = [16, 32], strides = [1, 1]} : vector<16x128xbf16> to vector<16x32xbf16>
    %176 = vector.extract_strided_slice %154 {offsets = [0, 96], sizes = [16, 32], strides = [1, 1]} : vector<16x128xbf16> to vector<16x32xbf16>
    %177 = vector.shape_cast %173 : vector<16x32xbf16> to vector<1x16x32xbf16>
    %178 = vector.shape_cast %174 : vector<16x32xbf16> to vector<1x16x32xbf16>
    %179 = vector.shape_cast %175 : vector<16x32xbf16> to vector<1x16x32xbf16>
    %180 = vector.shape_cast %176 : vector<16x32xbf16> to vector<1x16x32xbf16>
    %181 = tpu.concatenate %177, %178, %179, %180 in 0 : vector<1x16x32xbf16>, vector<1x16x32xbf16>, vector<1x16x32xbf16>, vector<1x16x32xbf16> -> vector<4x16x32xbf16>
    "tpu.trace_start"() <{level = 10 : i32, message = "htk,hsk->hts"}> : () -> ()
    %cst_63 = arith.constant dense<0.000000e+00> : vector<4x8x16xf32>
    %182 = tpu.matmul %163, %172, %cst_63 {dimension_numbers = #tpu.dot_dimension_numbers<[2], [2], [1], [1], [0, 0, 0, 1, 1, 1], [0], [0]>} : vector<4x8x32xbf16>, vector<4x16x32xbf16>, vector<4x8x16xf32> -> vector<4x8x16xf32>
    "tpu.trace_stop"() : () -> ()
    %183 = vector.shape_cast %7 : vector<8x16xf32> to vector<1x8x16xf32>
    %cst_64 = arith.constant 0.000000e+00 : f32
    %184 = vector.broadcast %cst_64 : f32 to vector<1x8x16xf32>
    %185 = arith.cmpf ogt, %183, %184 : vector<1x8x16xf32>
    %cst_65 = arith.constant -1.000000e+30 : f32
    %186 = vector.shape_cast %185 : vector<1x8x16xi1> to vector<1x8x16xi1>
    %187 = vector.broadcast %186 : vector<1x8x16xi1> to vector<4x8x16xi1>
    %188 = vector.broadcast %cst_65 : f32 to vector<4x8x16xf32>
    %189 = arith.select %187, %188, %182 : vector<4x8x16xi1>, vector<4x8x16xf32>
    %cst_66 = arith.constant dense<0xFF800000> : vector<4x8xf32>
    %190 = vector.multi_reduction <maximumf>, %189, %cst_66 [2] : vector<4x8x16xf32> to vector<4x8xf32>
    %191 = vector.shape_cast %190 : vector<4x8xf32> to vector<4x8x1xf32>
    %192 = vector.broadcast %191 : vector<4x8x1xf32> to vector<4x8x16xf32>
    %193 = arith.subf %189, %192 : vector<4x8x16xf32>
    %194 = math.exp %193 : vector<4x8x16xf32>
    %cst_67 = arith.constant dense<0.000000e+00> : vector<4x8xf32>
    %195 = vector.multi_reduction <add>, %194, %cst_67 [2] : vector<4x8x16xf32> to vector<4x8xf32>
    %196 = vector.shape_cast %195 : vector<4x8xf32> to vector<4x8x1xf32>
    %197 = tpu.reciprocal %196 {approx = true} : vector<4x8x1xf32> -> vector<4x8x1xf32>
    %198 = vector.broadcast %197 : vector<4x8x1xf32> to vector<4x8x16xf32>
    %199 = arith.mulf %194, %198 : vector<4x8x16xf32>
    %200 = arith.truncf %199 : vector<4x8x16xf32> to vector<4x8x16xbf16>
    "tpu.trace_start"() <{level = 10 : i32, message = "hts,hsk->htk"}> : () -> ()
    %cst_68 = arith.constant dense<0.000000e+00> : vector<4x8x32xf32>
    %201 = tpu.matmul %200, %181, %cst_68 {dimension_numbers = #tpu.dot_dimension_numbers<[2], [1], [1], [2], [0, 0, 0, 1, 1, 2], [0], [0]>} : vector<4x8x16xbf16>, vector<4x16x32xbf16>, vector<4x8x32xf32> -> vector<4x8x32xf32>
    "tpu.trace_stop"() : () -> ()
    %202 = vector.extract_strided_slice %201 {offsets = [0, 0, 0], sizes = [1, 8, 32], strides = [1, 1, 1]} : vector<4x8x32xf32> to vector<1x8x32xf32>
    %203 = vector.shape_cast %202 : vector<1x8x32xf32> to vector<8x32xf32>
    %204 = vector.extract_strided_slice %201 {offsets = [1, 0, 0], sizes = [1, 8, 32], strides = [1, 1, 1]} : vector<4x8x32xf32> to vector<1x8x32xf32>
    %205 = vector.shape_cast %204 : vector<1x8x32xf32> to vector<8x32xf32>
    %206 = vector.extract_strided_slice %201 {offsets = [2, 0, 0], sizes = [1, 8, 32], strides = [1, 1, 1]} : vector<4x8x32xf32> to vector<1x8x32xf32>
    %207 = vector.shape_cast %206 : vector<1x8x32xf32> to vector<8x32xf32>
    %208 = vector.extract_strided_slice %201 {offsets = [3, 0, 0], sizes = [1, 8, 32], strides = [1, 1, 1]} : vector<4x8x32xf32> to vector<1x8x32xf32>
    %209 = vector.shape_cast %208 : vector<1x8x32xf32> to vector<8x32xf32>
    %210 = tpu.concatenate %203, %205, %207, %209 in 1 : vector<8x32xf32>, vector<8x32xf32>, vector<8x32xf32>, vector<8x32xf32> -> vector<8x128xf32>
    %211 = arith.truncf %210 : vector<8x128xf32> to vector<8x128xbf16>
    %cst_69 = arith.constant dense<0.000000e+00> : vector<8x128xf32>
    %212 = tpu.matmul %211, %140, %cst_69 {dimension_numbers = #tpu.dot_dimension_numbers<[1], [0], [0], [1], [0, 0, 1, 1], [], []>} : vector<8x128xbf16>, vector<128x128xbf16>, vector<8x128xf32> -> vector<8x128xf32>
    %213 = vector.broadcast %141 : vector<1x128xf32> to vector<8x128xf32>
    %214 = arith.addf %212, %213 : vector<8x128xf32>
    %215 = arith.addf %111, %214 : vector<8x128xf32>
    %c0_70 = arith.constant 0 : index
    %c0_71 = arith.constant 0 : index
    %216 = vector.load %arg21[%c0_70, %c0_71] : memref<1x128xf32, #tpu.memory_space<vmem>>, vector<1x128xf32>
    %c0_72 = arith.constant 0 : index
    %c0_73 = arith.constant 0 : index
    %217 = vector.load %arg22[%c0_72, %c0_73] : memref<1x128xf32, #tpu.memory_space<vmem>>, vector<1x128xf32>
    %cst_74 = arith.constant dense<0.000000e+00> : vector<8xf32>
    %218 = vector.multi_reduction <add>, %215, %cst_74 [1] : vector<8x128xf32> to vector<8xf32>
    %219 = vector.shape_cast %218 : vector<8xf32> to vector<8x1xf32>
    %cst_75 = arith.constant 1.280000e+02 : f32
    %220 = vector.broadcast %cst_75 : f32 to vector<8x1xf32>
    %221 = arith.divf %219, %220 : vector<8x1xf32>
    %222 = vector.broadcast %221 : vector<8x1xf32> to vector<8x128xf32>
    %223 = arith.subf %215, %222 : vector<8x128xf32>
    %224 = arith.mulf %223, %223 : vector<8x128xf32>
    %cst_76 = arith.constant dense<0.000000e+00> : vector<8xf32>
    %225 = vector.multi_reduction <add>, %224, %cst_76 [1] : vector<8x128xf32> to vector<8xf32>
    %226 = vector.shape_cast %225 : vector<8xf32> to vector<8x1xf32>
    %cst_77 = arith.constant 1.280000e+02 : f32
    %227 = vector.broadcast %cst_77 : f32 to vector<8x1xf32>
    %228 = arith.divf %226, %227 : vector<8x1xf32>
    %229 = vector.broadcast %221 : vector<8x1xf32> to vector<8x128xf32>
    %230 = arith.subf %215, %229 : vector<8x128xf32>
    %cst_78 = arith.constant 9.99999974E-6 : f32
    %231 = vector.broadcast %cst_78 : f32 to vector<8x1xf32>
    %232 = arith.addf %228, %231 : vector<8x1xf32>
    %233 = math.rsqrt %232 : vector<8x1xf32>
    %234 = vector.broadcast %233 : vector<8x1xf32> to vector<8x128xf32>
    %235 = arith.mulf %230, %234 : vector<8x128xf32>
    %236 = vector.broadcast %216 : vector<1x128xf32> to vector<8x128xf32>
    %237 = arith.mulf %235, %236 : vector<8x128xf32>
    %238 = vector.broadcast %217 : vector<1x128xf32> to vector<8x128xf32>
    %239 = arith.addf %237, %238 : vector<8x128xf32>
    %240 = arith.truncf %239 : vector<8x128xf32> to vector<8x128xbf16>
    %c0_79 = arith.constant 0 : index
    %c0_80 = arith.constant 0 : index
    %241 = vector.load %arg23[%c0_79, %c0_80] : memref<128x256xbf16, #tpu.memory_space<vmem>>, vector<128x256xbf16>
    %cst_81 = arith.constant dense<0.000000e+00> : vector<8x256xf32>
    %242 = tpu.matmul %240, %241, %cst_81 {dimension_numbers = #tpu.dot_dimension_numbers<[1], [0], [0], [1], [0, 0, 1, 1], [], []>} : vector<8x128xbf16>, vector<128x256xbf16>, vector<8x256xf32> -> vector<8x256xf32>
    %c0_82 = arith.constant 0 : index
    %c0_83 = arith.constant 0 : index
    %243 = vector.load %arg24[%c0_82, %c0_83] : memref<1x256xf32, #tpu.memory_space<vmem>>, vector<1x256xf32>
    %244 = vector.broadcast %243 : vector<1x256xf32> to vector<8x256xf32>
    %245 = arith.addf %242, %244 : vector<8x256xf32>
    %cst_84 = arith.constant 0.000000e+00 : f32
    %246 = vector.broadcast %cst_84 : f32 to vector<8x256xf32>
    %247 = arith.maximumf %245, %246 : vector<8x256xf32>
    %248 = arith.truncf %247 : vector<8x256xf32> to vector<8x256xbf16>
    %c0_85 = arith.constant 0 : index
    %c0_86 = arith.constant 0 : index
    %249 = vector.load %arg25[%c0_85, %c0_86] : memref<256x128xbf16, #tpu.memory_space<vmem>>, vector<256x128xbf16>
    %cst_87 = arith.constant dense<0.000000e+00> : vector<8x128xf32>
    %250 = tpu.matmul %248, %249, %cst_87 {dimension_numbers = #tpu.dot_dimension_numbers<[1], [0], [0], [1], [0, 0, 1, 1], [], []>} : vector<8x256xbf16>, vector<256x128xbf16>, vector<8x128xf32> -> vector<8x128xf32>
    %c0_88 = arith.constant 0 : index
    %c0_89 = arith.constant 0 : index
    %251 = vector.load %arg26[%c0_88, %c0_89] : memref<1x128xf32, #tpu.memory_space<vmem>>, vector<1x128xf32>
    %252 = vector.broadcast %251 : vector<1x128xf32> to vector<8x128xf32>
    %253 = arith.addf %250, %252 : vector<8x128xf32>
    %254 = arith.addf %215, %253 : vector<8x128xf32>
    %c0_90 = arith.constant 0 : index
    %c0_91 = arith.constant 0 : index
    %c0_92 = arith.constant 0 : index
    %255 = vector.load %arg27[%c0_90, %c0_91, %c0_92] : memref<1x8x128xf32, #tpu.memory_space<vmem>>, vector<1x8x128xf32>
    %256 = vector.shape_cast %255 : vector<1x8x128xf32> to vector<8x128xf32>
    %257 = vector.shape_cast %254 : vector<8x128xf32> to vector<1x8x128xf32>
    tpu.vector_store %arg27[%c0_90, %c0_91, %c0_92], %257 {strides = array<i32>} : memref<1x8x128xf32, #tpu.memory_space<vmem>>, vector<1x8x128xf32>,
    return
  }
  func.func @transform_0(%arg0: i32) -> (i32, i32, i32) {
    %c0_i32 = arith.constant 0 : i32
    %c0_i32_0 = arith.constant 0 : i32
    %c0_i32_1 = arith.constant 0 : i32
    return %arg0, %c0_i32, %c0_i32_0 : i32, i32, i32
  }
  func.func @transform_1(%arg0: i32) -> (i32, i32, i32) {
    %c0_i32 = arith.constant 0 : i32
    %c0_i32_0 = arith.constant 0 : i32
    %c0_i32_1 = arith.constant 0 : i32
    return %arg0, %c0_i32, %c0_i32_0 : i32, i32, i32
  }
  func.func @transform_2(%arg0: i32) -> (i32, i32, i32) {
    %c0_i32 = arith.constant 0 : i32
    %c0_i32_0 = arith.constant 0 : i32
    %c0_i32_1 = arith.constant 0 : i32
    return %arg0, %c0_i32, %c0_i32_0 : i32, i32, i32
  }
  func.func @transform_3(%arg0: i32) -> (i32, i32, i32) {
    %c0_i32 = arith.constant 0 : i32
    %c0_i32_0 = arith.constant 0 : i32
    %c0_i32_1 = arith.constant 0 : i32
    return %arg0, %c0_i32, %c0_i32_0 : i32, i32, i32
  }
  func.func @transform_4(%arg0: i32) -> (i32, i32) {
    %c0_i32 = arith.constant 0 : i32
    %c0_i32_0 = arith.constant 0 : i32
    %c0_i32_1 = arith.constant 0 : i32
    return %c0_i32, %c0_i32_0 : i32, i32
  }
  func.func @transform_5(%arg0: i32) -> (i32, i32) {
    %c0_i32 = arith.constant 0 : i32
    %c0_i32_0 = arith.constant 0 : i32
    %c0_i32_1 = arith.constant 0 : i32
    return %c0_i32, %c0_i32_0 : i32, i32
  }
  func.func @transform_6(%arg0: i32) -> (i32, i32) {
    %c0_i32 = arith.constant 0 : i32
    %c0_i32_0 = arith.constant 0 : i32
    %c0_i32_1 = arith.constant 0 : i32
    return %c0_i32, %c0_i32_0 : i32, i32
  }
  func.func @transform_7(%arg0: i32) -> (i32, i32) {
    %c0_i32 = arith.constant 0 : i32
    %c0_i32_0 = arith.constant 0 : i32
    %c0_i32_1 = arith.constant 0 : i32
    return %c0_i32, %c0_i32_0 : i32, i32
  }
  func.func @transform_8(%arg0: i32) -> (i32, i32) {
    %c0_i32 = arith.constant 0 : i32
    %c0_i32_0 = arith.constant 0 : i32
    %c0_i32_1 = arith.constant 0 : i32
    return %c0_i32, %c0_i32_0 : i32, i32
  }
  func.func @transform_9(%arg0: i32) -> (i32, i32) {
    %c0_i32 = arith.constant 0 : i32
    %c0_i32_0 = arith.constant 0 : i32
    %c0_i32_1 = arith.constant 0 : i32
    return %c0_i32, %c0_i32_0 : i32, i32
  }
  func.func @transform_10(%arg0: i32) -> (i32, i32) {
    %c0_i32 = arith.constant 0 : i32
    %c0_i32_0 = arith.constant 0 : i32
    %c0_i32_1 = arith.constant 0 : i32
    return %c0_i32, %c0_i32_0 : i32, i32
  }
  func.func @transform_11(%arg0: i32) -> (i32, i32) {
    %c0_i32 = arith.constant 0 : i32
    %c0_i32_0 = arith.constant 0 : i32
    %c0_i32_1 = arith.constant 0 : i32
    return %c0_i32, %c0_i32_0 : i32, i32
  }
  func.func @transform_12(%arg0: i32) -> (i32, i32) {
    %c0_i32 = arith.constant 0 : i32
    %c0_i32_0 = arith.constant 0 : i32
    %c0_i32_1 = arith.constant 0 : i32
    return %c0_i32, %c0_i32_0 : i32, i32
  }
  func.func @transform_13(%arg0: i32) -> (i32, i32) {
    %c0_i32 = arith.constant 0 : i32
    %c0_i32_0 = arith.constant 0 : i32
    %c0_i32_1 = arith.constant 0 : i32
    return %c0_i32, %c0_i32_0 : i32, i32
  }
  func.func @transform_14(%arg0: i32) -> (i32, i32) {
    %c0_i32 = arith.constant 0 : i32
    %c0_i32_0 = arith.constant 0 : i32
    %c0_i32_1 = arith.constant 0 : i32
    return %c0_i32, %c0_i32_0 : i32, i32
  }
  func.func @transform_15(%arg0: i32) -> (i32, i32) {
    %c0_i32 = arith.constant 0 : i32
    %c0_i32_0 = arith.constant 0 : i32
    %c0_i32_1 = arith.constant 0 : i32
    return %c0_i32, %c0_i32_0 : i32, i32
  }
  func.func @transform_16(%arg0: i32) -> (i32, i32) {
    %c0_i32 = arith.constant 0 : i32
    %c0_i32_0 = arith.constant 0 : i32
    %c0_i32_1 = arith.constant 0 : i32
    return %c0_i32, %c0_i32_0 : i32, i32
  }
  func.func @transform_17(%arg0: i32) -> (i32, i32) {
    %c0_i32 = arith.constant 0 : i32
    %c0_i32_0 = arith.constant 0 : i32
    %c0_i32_1 = arith.constant 0 : i32
    return %c0_i32, %c0_i32_0 : i32, i32
  }
  func.func @transform_18(%arg0: i32) -> (i32, i32) {
    %c0_i32 = arith.constant 0 : i32
    %c0_i32_0 = arith.constant 0 : i32
    %c0_i32_1 = arith.constant 0 : i32
    return %c0_i32, %c0_i32_0 : i32, i32
  }
  func.func @transform_19(%arg0: i32) -> (i32, i32) {
    %c0_i32 = arith.constant 0 : i32
    %c0_i32_0 = arith.constant 0 : i32
    %c0_i32_1 = arith.constant 0 : i32
    return %c0_i32, %c0_i32_0 : i32, i32
  }
  func.func @transform_20(%arg0: i32) -> (i32, i32) {
    %c0_i32 = arith.constant 0 : i32
    %c0_i32_0 = arith.constant 0 : i32
    %c0_i32_1 = arith.constant 0 : i32
    return %c0_i32, %c0_i32_0 : i32, i32
  }
  func.func @transform_21(%arg0: i32) -> (i32, i32) {
    %c0_i32 = arith.constant 0 : i32
    %c0_i32_0 = arith.constant 0 : i32
    %c0_i32_1 = arith.constant 0 : i32
    return %c0_i32, %c0_i32_0 : i32, i32
  }
  func.func @transform_22(%arg0: i32) -> (i32, i32) {
    %c0_i32 = arith.constant 0 : i32
    %c0_i32_0 = arith.constant 0 : i32
    %c0_i32_1 = arith.constant 0 : i32
    return %c0_i32, %c0_i32_0 : i32, i32
  }
  func.func @transform_23(%arg0: i32) -> (i32, i32) {
    %c0_i32 = arith.constant 0 : i32
    %c0_i32_0 = arith.constant 0 : i32
    %c0_i32_1 = arith.constant 0 : i32
    return %c0_i32, %c0_i32_0 : i32, i32
  }
  func.func @transform_24(%arg0: i32) -> (i32, i32) {
    %c0_i32 = arith.constant 0 : i32
    %c0_i32_0 = arith.constant 0 : i32
    %c0_i32_1 = arith.constant 0 : i32
    return %c0_i32, %c0_i32_0 : i32, i32
  }
  func.func @transform_25(%arg0: i32) -> (i32, i32) {
    %c0_i32 = arith.constant 0 : i32
    %c0_i32_0 = arith.constant 0 : i32
    %c0_i32_1 = arith.constant 0 : i32
    return %c0_i32, %c0_i32_0 : i32, i32
  }
  func.func @transform_26(%arg0: i32) -> (i32, i32, i32) {
    %c0_i32 = arith.constant 0 : i32
    %c0_i32_0 = arith.constant 0 : i32
    %c0_i32_1 = arith.constant 0 : i32
    return %arg0, %c0_i32, %c0_i32_0 : i32, i32, i32
  }
}

</mosaic_0001>

<bundles_post_ra>
// kernel: tpu_custom_call.1
= control target key start
LH: loop header
LB: loop body
LE: loop exit
PB: predicated region body
PF: predicated region fallthrough
CT: control target
= control target key end

     0   :  { %s5293_s0 = inlined_call_operand.hbm [shape: f32[2,8,128], index: 0, kind: input, shape index: {}]   ;;  %s5294_s1 = inlined_call_operand.hbm [shape: f32[2,16,128], index: 1, kind: input, shape index: {}]   ;;  %s5295_s2 = inlined_call_operand.hbm [shape: f32[2,8,8], index: 2, kind: input, shape index: {}]   ;;  %s5296_s3 = inlined_call_operand.hbm [shape: f32[2,8,16], index: 3, kind: input, shape index: {}]   ;;  %s5297_s4 = inlined_call_operand.vmem [shape: f32[1,128], index: 4, kind: input, shape index: {}]   ;;  %s5298_s5 = inlined_call_operand.vmem [shape: f32[1,128], index: 5, kind: input, shape index: {}]   ;;  %s5299_s6 = inlined_call_operand.hbm [shape: bf16[128,128], index: 6, kind: input, shape index: {}]   ;;  %s5300_s7 = inlined_call_operand.vmem [shape: f32[1,128], index: 7, kind: input, shape index: {}]   ;;  %s5301_s8 = inlined_call_operand.hbm [shape: bf16[128,256], index: 8, kind: input, shape index: {}]   ;;  %s5302_s9 = inlined_call_operand.vmem [shape: f32[1,256], index: 9, kind: input, shape index: {}]   ;;  %s5303_s10 = inlined_call_operand.hbm [shape: bf16[128,128], index: 10, kind: input, shape index: {}]   ;;  %s5304_s11 = inlined_call_operand.vmem [shape: f32[1,128], index: 11, kind: input, shape index: {}]   ;;  %s5305_s12 = inlined_call_operand.vmem [shape: f32[1,128], index: 12, kind: input, shape index: {}]   ;;  %s5306_s13 = inlined_call_operand.vmem [shape: f32[1,128], index: 13, kind: input, shape index: {}]   ;;  %s5307_s14 = inlined_call_operand.hbm [shape: bf16[128,128], index: 14, kind: input, shape index: {}]   ;;  %s5308_s15 = inlined_call_operand.vmem [shape: f32[1,128], index: 15, kind: input, shape index: {}]   ;;  %s5309_s16 = inlined_call_operand.hbm [shape: bf16[128,256], index: 16, kind: input, shape index: {}]   ;;  %s5310_s17 = inlined_call_operand.vmem [shape: f32[1,256], index: 17, kind: input, shape index: {}]   ;;  %s5311_s18 = inlined_call_operand.hbm [shape: bf16[128,128], index: 18, kind: input, shape index: {}]   ;;  %s5312_s19 = inlined_call_operand.vmem [shape: f32[1,128], index: 19, kind: input, shape index: {}]   ;;  %s5313_s20 = inlined_call_operand.vmem [shape: f32[1,128], index: 20, kind: input, shape index: {}]   ;;  %s5314_s21 = inlined_call_operand.vmem [shape: f32[1,128], index: 21, kind: input, shape index: {}]   ;;  %s5315_s22 = inlined_call_operand.hbm [shape: bf16[128,256], index: 22, kind: input, shape index: {}]   ;;  %s5316_s23 = inlined_call_operand.vmem [shape: f32[1,256], index: 23, kind: input, shape index: {}]   ;;  %s5317_s24 = inlined_call_operand.hbm [shape: bf16[256,128], index: 24, kind: input, shape index: {}]   ;;  %s5318_s25 = inlined_call_operand.vmem [shape: f32[1,128], index: 25, kind: input, shape index: {}]   ;;  %s5319_s26 = inlined_call_operand.hbm [shape: f32[2,8,128], index: 26, kind: output, shape index: {}]  }
   0x1   :  { %5351 = sst [smem:[#allocation38_spill]] %s5293_s0 }
   0x2   :  { %5352 = sst [smem:[#allocation39_spill]] %s5294_s1 }
   0x3   :  { %5353 = sst [smem:[#allocation40_spill]] %s5295_s2 }
   0x4   :  { %5354 = sst [smem:[#allocation41_spill]] %s5296_s3 }
   0x5   :  { %5355 = sst [smem:[#allocation42_spill]] %s5297_s4 }
   0x6   :  { %5356 = sst [smem:[#allocation43_spill]] %s5298_s5 }
   0x7   :  { %5357 = sst [smem:[#allocation44_spill]] %s5299_s6 }
   0x8   :  { %5358 = sst [smem:[#allocation45_spill]] %s5300_s7 }
   0x9   :  { %5359 = sst [smem:[#allocation46_spill]] %s5301_s8 }
   0xa   :  { %5360 = sst [smem:[#allocation47_spill]] %s5302_s9 }
   0xb   :  { %5361 = sst [smem:[#allocation48_spill]] %s5303_s10 }
   0xc   :  { %5362 = sst [smem:[#allocation49_spill]] %s5307_s14 }
   0xd   :  { %5363 = sst [smem:[#allocation50_spill]] %s5309_s16 }
   0xe   :  { %5364 = sst [smem:[#allocation51_spill]] %s5311_s18 }
   0xf   :  { %5365 = sst [smem:[#allocation52_spill]] %s5312_s19 }
  0x10   :  { %5366 = sst [smem:[#allocation53_spill]] %s5313_s20 }
  0x11   :  { %5367 = sst [smem:[#allocation54_spill]] %s5314_s21 }
  0x12   :  { %5368 = sst [smem:[#allocation55_spill]] %s5315_s22 }
  0x13   :  { %5369 = sst [smem:[#allocation56_spill]] %s5316_s23 }
  0x14   :  { %5370 = sst [smem:[#allocation57_spill]] %s5318_s25 }
  0x15   :  { %5371 = sst [smem:[#allocation58_spill]] %s5319_s26 }
  0x16   :  { %31 = vsyncpa [#allocation3], 0 }
  0x17   :  { %33 = vsyncpa [#allocation3 + $0x1], 0 }
  0x18   :  { %34 = vsyncpa [#allocation6], 0 }
  0x19   :  { %36 = vsyncpa [#allocation6 + $0x1], 0 }
  0x1a   :  { %37 = vsyncpa [#allocation9], 0 }
  0x1b   :  { %39 = vsyncpa [#allocation9 + $0x1], 0 }
  0x1c   :  { %40 = vsyncpa [#allocation12], 0 }
  0x1d   :  { %41 = vsyncpa [#allocation15], 0 }
  0x1e   :  { %42 = vsyncpa [#allocation18], 0 }
  0x1f   :  { %43 = vsyncpa [#allocation21], 0 }
  0x20   :  { %44 = vsyncpa [#allocation4], 0 }
  0x21   :  { %46 = vsyncpa [#allocation4 + $0x1], 0  ;;  %s4661_s27 = smov 0   ;;  %s4663_s3 = smov 0  }
  0x22   :  { %s4665_s7 = smov 0   ;;  %s4667_s28 = smov 0  }
  0x23 LB: > { %5372 = sst [smem:[#allocation32_spill]] %s4489_s27  ;;  %s4503_s8 = smov [#allocation10]   ;;  %s4501_s28 = sphi %s4667_s28, %s5433_s28   ;;  %s4497_s7 = sphi %s4665_s7, %s5435_s7   ;;  %s4493_s3 = sphi %s4663_s3, %s5437_s3   ;;  %s4489_s27 = sphi %s4661_s27, %s5436_s27  }
  0x24   : > { %5373 = sst [smem:[#allocation33_spill]] %s4497_s7  ;;  %s667_s4 = sshll.u32 %s4503_s8, 4  ;;  %s668_s4 = int_to_ptr.vmem [resolvable:$true] %s667_s4 }
  0x25   : > { %s4682_s29 = sadd.s32 4294967295, %s4501_s28   ;;  %p3352_p0 = scmp.ge.s32.totalorder %s4501_s28, 1 }
  0x26   : > { %p5339_p1 = scmp.eq.s32.totalorder %s4682_s29, 0  ;;  %p649_p2 = scmp.lt.s32.totalorder %s4501_s28, 3 }
  0x27   : > { %s4504_s9 = smov [#allocation11]   ;;  %s4505_s5 = smov [#allocation14]  }
  0x28   : > { %p4687_p3 = pnand %p3352_p0, %p649_p2  ;;  %s683_s30 = sshll.u32 %s4504_s9, 4  ;;  %s4700_s30 = int_to_ptr.vmem [resolvable:$true] %s683_s30 }
  0x29   : > { %s4702_s10 = sshll.u32 %s4505_s5, 4  ;;  %s4100_s1 = scalar_lea.vmem %s668_s4, 1024  ;;  %s722_s10 = int_to_ptr.vmem [resolvable:$true] %s4702_s10 }
  0x2a   : > { %s5374_s0 = scalar_select %p4687_p3, 1, 0 }
  0x2b   : > { %p3821_p5 = pneg %p4687_p3  ;;  %p4101_p8 = scmp.ne.s32.totalorder %s668_s4, %s4100_s1 }
  0x2c   : > { %p4108_p11 = scmp.lt.s32.totalorder %s668_s4, %s668_s4  ;;  %p4109_p12 = scmp.lt.s32.totalorder %s4100_s1, %s4100_s1 }
  0x2d   : > { %p4696_p6 = pnand %p3821_p5, %p5339_p1 }
  0x2e   : > { %p4110_p13 = por %p4109_p12, %p4108_p11 }
  0x2f   : > { %s5375_s2 = scalar_select %p4696_p6, 1, 0 }
  0x30   : > { %p4706_p7 = pneg %p4696_p6 }
  0x32   : > { %s5376_s6 = scalar_select %p4706_p7, 1, 0 }
  0x33   : > { %p4103_p9 = pnand %p4101_p8, %p4706_p7 }
  0x35   : > { %p4104_p10 = pneg %p4103_p9 }
  0x37   : > { %p4111_p0 = pnand %p4110_p13, %p4104_p10 }
  0x39   : > { %4114 = shalt.err (!%p4111_p0)
}
  0x3a   : > { %s5326_s8 = smov 64   ;;  %s5328_s9 = smov 4  }
  0x3b   : > { %s5377_s25 = sld [smem:[#allocation44_spill]]  ;;  %s4126_s23 = scalar_lea.vmem %s4700_s30, 2048 }
  0x3c   : > { %p4127_p2 = scmp.ne.s32.totalorder %s4700_s30, %s4126_s23  ;;  %p4134_p9 = scmp.lt.s32.totalorder %s4700_s30, %s4700_s30 }
  0x3d   : > { %p4135_p10 = scmp.lt.s32.totalorder %s4126_s23, %s4126_s23 }
  0x3e   : > { %p4129_p5 = pnand %p4127_p2, %p4706_p7 }
  0x3f   : > { %p4136_p11 = por %p4135_p10, %p4134_p9 }
  0x40   : > { %p4130_p8 = pneg %p4129_p5 }
  0x41   : > { %3824 = dma.hbm_to_vmem [thread:$0]  (!%p4696_p6), %s5377_s25, 1024, %s668_s4, [#allocation9], %s5326_s8, %s5326_s8, %s5328_s9  }
  0x42   : > { %p4137_p12 = pnand %p4136_p11, %p4130_p8 }
  0x44   : > { %4140 = shalt.err (!%p4137_p12)
}
  0x45   : > { %s5330_s1 = smov 128   ;;  %s5332_s21 = smov 8  }
  0x46   : > { %s5378_s4 = sld [smem:[#allocation46_spill]]  ;;  %s4152_s5 = scalar_lea.vmem %s722_s10, 1024 }
  0x47   : > { %p4153_p13 = scmp.ne.s32.totalorder %s722_s10, %s4152_s5  ;;  %p4160_p5 = scmp.lt.s32.totalorder %s722_s10, %s722_s10 }
  0x48   : > { %p4161_p8 = scmp.lt.s32.totalorder %s4152_s5, %s4152_s5 }
  0x49   : > { %p4155_p0 = pnand %p4153_p13, %p4706_p7 }
  0x4a   : > { %p4162_p9 = por %p4161_p8, %p4160_p5 }
  0x4b   : > { %p4156_p2 = pneg %p4155_p0 }
  0x4c   : > { %3827 = dma.hbm_to_vmem [thread:$0]  (!%p4696_p6), %s5378_s4, 2048, %s4700_s30, [#allocation12], %s5330_s1, %s5330_s1, %s5332_s21  }
  0x4d   : > { %p4163_p10 = pnand %p4162_p9, %p4156_p2 }
  0x4f   : > { %4166 = shalt.err (!%p4163_p10)
}
  0x50   : > { %s5379_s14 = sld [smem:[#allocation49_spill]]  ;;  %s4510_s30 = smov [#allocation17]  }
  0x51   : > { %s753_s25 = sshll.u32 %s4510_s30, 4  ;;  %s754_s25 = int_to_ptr.vmem [resolvable:$true] %s753_s25 }
  0x52   : > { %s4178_s26 = scalar_lea.vmem %s754_s25, 1024  ;;  %p4186_p0 = scmp.lt.s32.totalorder %s754_s25, %s754_s25 }
  0x53   : > { %p4179_p11 = scmp.ne.s32.totalorder %s754_s25, %s4178_s26  ;;  %p4187_p2 = scmp.lt.s32.totalorder %s4178_s26, %s4178_s26 }
  0x55   : > { %p4181_p12 = pnand %p4179_p11, %p4706_p7  ;;  %p4188_p5 = por %p4187_p2, %p4186_p0 }
  0x56   : > { %3833 = dma.hbm_to_vmem [thread:$0]  (!%p4696_p6), %s5379_s14, 1024, %s722_s10, [#allocation15], %s5326_s8, %s5326_s8, %s5328_s9  }
  0x57   : > { %p4182_p13 = pneg %p4181_p12 }
  0x59   : > { %p4189_p8 = pnand %p4188_p5, %p4182_p13 }
  0x5b   : > { %4192 = shalt.err (!%p4189_p8)
}
  0x5c   : > { %s5380_s18 = sld [smem:[#allocation51_spill]]  ;;  %s3351_s4 = sadd.s32 4294967294, %s4501_s28  }
  0x5d   : > { %s4758_s5 = sadd.s32 1, %s4501_s28   ;;  %s59_s30 = sadd.s32 1, %s4497_s7 }
  0x5e   : > { %5381 = sst [smem:[#allocation34_spill]] %s4758_s5  ;;  %s56_s23 = ssub.s32 %s4501_s28, %s4758_s5 }
  0x5f   : > { %p57_p9 = scmp.eq.s32.totalorder %s56_s23, 0  ;;  %p66_p10 = scmp.ne.s32.totalorder %s4497_s7, %s4493_s3 }
  0x60   : > { %p67_p11 = scmp.eq.s32.totalorder %s4501_s28, 0  ;;  %p72_p12 = scmp.ne.s32.totalorder %s4493_s3, %s4489_s27 }
  0x61   : > { %s4769_s26 = scalar_select %p57_p9, %s4497_s7, %s59_s30  }
  0x62   : > { %3839 = dma.hbm_to_vmem [thread:$0]  (!%p4696_p6), %s5380_s18, 1024, %s754_s25, [#allocation18], %s5326_s8, %s5326_s8, %s5328_s9  }
  0x63   : > { %5382 = sst [smem:[#allocation35_spill]] %s4769_s26  ;;  %p68_p13 = por %p67_p11, %p66_p10 }
  0x64   : > { %p4773_p0 = por %p5339_p1, %p72_p12  ;;  %p636_p2 = scmp.eq.s32.totalorder %s4682_s29, 1 }
  0x65   : > { %p642_p5 = scmp.eq.s32.totalorder %s3351_s4, 1  ;;  %p3871_p8 = scmp.lt.s32.totalorder %s4501_s28, 2 }
  0x66   : > { %s5383_s20 = scalar_select %p4773_p0, 1, 0 }
  0x67   : > { %s4780_s25 = sand.u32 1, %s4497_s7   ;;  %p4782_p4 = por %p636_p2, %p66_p10 }
  0x68   : > { %p4786_p3 = por %p642_p5, %p72_p12  ;;  %p4790_p9 = pnand %p3871_p8, %p68_p13 }
  0x69   : > { %s5384_s10 = scalar_select %p4782_p4, 1, 0 }
  0x6a   : > { %s5386_s23 = scalar_select %p4786_p3, 1, 0 }
  0x6b   : > { %5385 = sst [smem:[#allocation36_spill]] %s5384_s10  ;;  %s5340_s8 = sand.u32 1, %s4501_s28  }
  0x6c   : > { %5387 = sst [smem:[#allocation37_spill]] %s5386_s23  ;;  %s3364_s9 = sshll.u32 %s4780_s25, 4 }
  0x6d   : > { %s3512_s4 = sshll.u32 %s4501_s28, 8  ;;  %s830_s1 = scalar_lea.vmem [#allocation5], %s3364_s9 }
  0x6e   : > { %s837_s21 = sshll.u32 %s830_s1, 4  ;;  %s5389_s26 = sld [smem:[#allocation39_spill]]  ;;  %s4802_s21 = int_to_ptr.vmem [resolvable:$true] %s837_s21 }
  0x6f   : > { %s4806_s5 = scalar_lea.sflag [#allocation6], %s5340_s8  ;;  %p4812_p11 = pneg %p4790_p9 }
  0x74   : > { %s4800_s7 = scalar_lea.hbm %s5389_s26, %s3512_s4  ;;  %s4198_s9 = scalar_lea.hbm %s5389_s26, 512 }
  0x75   : > { %s4193_s23 = scalar_lea.hbm %s4800_s7, 256  ;;  %p4199_p2 = scmp.lt.s32.totalorder %s4800_s7, %s5389_s26 }
  0x76   : > { %p4194_p10 = scmp.ne.s32.totalorder %s4800_s7, %s4193_s23  ;;  %p4200_p5 = scmp.lt.s32.totalorder %s4198_s9, %s4193_s23 }
  0x78   : > { %p4196_p12 = pnand %p4812_p11, %p4194_p10  ;;  %p4201_p8 = por %p4200_p5, %p4199_p2 }
  0x7a   : > { %p4197_p13 = pneg %p4196_p12 }
  0x7c   : > { %p4202_p1 = pnand %p4201_p8, %p4197_p13 }
  0x7e   : > { %4205 = shalt.err (!%p4202_p1)
}
  0x7f   : > { %s4206_s8 = scalar_lea.vmem %s4802_s21, 256  ;;  %s4511_s10 = smov [#allocation5]  }
  0x80   : > { %p4207_p3 = scmp.ne.s32.totalorder %s4802_s21, %s4206_s8  ;;  %s4211_s14 = sshll.u32 %s4511_s10, 4  ;;  %s4212_s14 = int_to_ptr.vmem [resolvable:$false] %s4211_s14 }
  0x81   : > { %s4213_s18 = scalar_lea.vmem %s4212_s14, 512  ;;  %p4214_p4 = scmp.lt.s32.totalorder %s4802_s21, %s4212_s14 }
  0x82   : > { %p4209_p10 = pnand %p4207_p3, %p4812_p11  ;;  %p4215_p0 = scmp.lt.s32.totalorder %s4213_s18, %s4206_s8 }
  0x84   : > { %p4210_p12 = pneg %p4209_p10  ;;  %p4216_p6 = por %p4215_p0, %p4214_p4 }
  0x86   : > { %p4217_p7 = pnand %p4216_p6, %p4210_p12 }
  0x88   : > { %4220 = shalt.err (!%p4217_p7)
}
  0x89   : > { %s5391_s23 = smov 8   ;;  %s5392_s9 = smov 128  }
  0x8a   : > { %3852 = dma.hbm_to_vmem [thread:$0]  (!%p4790_p9), %s4800_s7, 256, %s4802_s21, %s4806_s5, %s5392_s9, %s5392_s9, %s5391_s23  }
  0x8b   : > { %s4512_s1 = smov [#allocation13]   ;;  %s4513_s10 = smov [#allocation16]  }
  0x8c   : > { %s699_s4 = sshll.u32 %s4512_s1, 4  ;;  %s737_s26 = sshll.u32 %s4513_s10, 4  ;;  %s700_s4 = int_to_ptr.vmem [resolvable:$true] %s699_s4  ;;  %s738_s26 = int_to_ptr.vmem [resolvable:$true] %s737_s26 }
  0x8d   : > { %s4232_s8 = scalar_lea.vmem %s700_s4, 1024  ;;  %p5393_p3 = scmp.ne.s32.totalorder %s5376_s6, 0 }
  0x8e   : > { %p4233_p1 = scmp.ne.s32.totalorder %s700_s4, %s4232_s8  ;;  %p4240_p7 = scmp.lt.s32.totalorder %s700_s4, %s700_s4 }
  0x8f   : > { %p4241_p0 = scmp.lt.s32.totalorder %s4232_s8, %s4232_s8 }
  0x90   : > { %p4235_p4 = pnand %p4233_p1, %p5393_p3 }
  0x91   : > { %p4242_p13 = por %p4241_p0, %p4240_p7 }
  0x92   : > { %p4236_p6 = pneg %p4235_p4 }
  0x94   : > { %p4243_p2 = pnand %p4242_p13, %p4236_p6 }
  0x96   : > { %4246 = shalt.err (!%p4243_p2)
}
  0x97   : > { %p5394_p5 = scmp.ne.s32.totalorder %s5375_s2, 0  ;;  %s5395_s14 = smov 4  }
  0x98   : > { %s5396_s21 = smov 64   ;;  %s5397_s1 = sld [smem:[#allocation48_spill]] }
  0x99   : > { %s4258_s10 = scalar_lea.vmem %s738_s26, 2048  ;;  %p4266_p1 = scmp.lt.s32.totalorder %s738_s26, %s738_s26 }
  0x9a   : > { %p4259_p8 = scmp.ne.s32.totalorder %s738_s26, %s4258_s10  ;;  %p4267_p4 = scmp.lt.s32.totalorder %s4258_s10, %s4258_s10 }
  0x9c   : > { %p4261_p10 = pnand %p4259_p8, %p5393_p3  ;;  %p4268_p7 = por %p4267_p4, %p4266_p1 }
  0x9e   : > { %3830 = dma.hbm_to_vmem [thread:$0]  (!%p5394_p5), %s5397_s1, 1024, %s700_s4, [#allocation12], %s5396_s21, %s5396_s21, %s5395_s14  }
  0x9f   : > { %p4262_p12 = pneg %p4261_p10 }
  0xa1   : > { %p4269_p6 = pnand %p4268_p7, %p4262_p12 }
  0xa3   : > { %4272 = shalt.err (!%p4269_p6)
}
  0xa4   : > { %s5398_s16 = sld [smem:[#allocation50_spill]]  ;;  %s4514_s4 = smov [#allocation19]  }
  0xa5   : > { %s775_s7 = sshll.u32 %s4514_s4, 4  ;;  %s4515_s18 = smov [#allocation20]   ;;  %s776_s7 = int_to_ptr.vmem [resolvable:$true] %s775_s7 }
  0xa6   : > { %s791_s1 = sshll.u32 %s4515_s18, 4  ;;  %s4284_s10 = scalar_lea.vmem %s776_s7, 2048  ;;  %s792_s1 = int_to_ptr.vmem [resolvable:$true] %s791_s1 }
  0xa7   : > { %p4285_p0 = scmp.ne.s32.totalorder %s776_s7, %s4284_s10  ;;  %p4292_p8 = scmp.lt.s32.totalorder %s776_s7, %s776_s7 }
  0xa8   : > { %p4293_p10 = scmp.lt.s32.totalorder %s4284_s10, %s4284_s10 }
  0xa9   : > { %p4287_p13 = pnand %p4285_p0, %p5393_p3 }
  0xaa   : > { %3836 = dma.hbm_to_vmem [thread:$0]  (!%p5394_p5), %s5398_s16, 2048, %s738_s26, [#allocation15], %s5392_s9, %s5392_s9, %s5391_s23  }
  0xab   : > { %p4288_p2 = pneg %p4287_p13  ;;  %p4294_p12 = por %p4293_p10, %p4292_p8 }
  0xad   : > { %p4295_p1 = pnand %p4294_p12, %p4288_p2 }
  0xaf   : > { %4298 = shalt.err (!%p4295_p1)
}
  0xb0   : > { %s5399_s22 = sld [smem:[#allocation55_spill]]  ;;  %s4310_s8 = scalar_lea.vmem %s792_s1, 2048 }
  0xb1   : > { %p4311_p4 = scmp.ne.s32.totalorder %s792_s1, %s4310_s8  ;;  %p4318_p0 = scmp.lt.s32.totalorder %s792_s1, %s792_s1 }
  0xb2   : > { %p4319_p13 = scmp.lt.s32.totalorder %s4310_s8, %s4310_s8 }
  0xb3   : > { %p4313_p7 = pnand %p4311_p4, %p5393_p3 }
  0xb4   : > { %p4320_p8 = por %p4319_p13, %p4318_p0 }
  0xb5   : > { %p4314_p6 = pneg %p4313_p7 }
  0xb6   : > { %3842 = dma.hbm_to_vmem [thread:$0]  (!%p5394_p5), %s5399_s22, 2048, %s776_s7, [#allocation18], %s5392_s9, %s5392_s9, %s5391_s23  }
  0xb7   : > { %p4321_p2 = pnand %p4320_p8, %p4314_p6 }
  0xb9   : > { %4324 = shalt.err (!%p4321_p2)
}
  0xba   : > { %3845 = dma.hbm_to_vmem [thread:$0]  (!%p5394_p5), %s5317_s24, 2048, %s792_s1, [#allocation21], %s5396_s21, %s5396_s21, %s5395_s14  }
  0xbb   : > { %s4879_s6 = sshll.u32 %s4780_s25, 3  ;;  %s4882_s23 = sshll.u32 %s4501_s28, 7 }
  0xbc   : > { %s5400_s2 = sld [smem:[#allocation38_spill]]  ;;  %s812_s19 = scalar_lea.vmem [#allocation2], %s4879_s6 }
  0xbd   : > { %s819_s26 = sshll.u32 %s812_s19, 4  ;;  %s809_s8 = scalar_lea.sflag [#allocation3], %s4780_s25  ;;  %s820_s26 = int_to_ptr.vmem [resolvable:$true] %s819_s26 }
  0xc2   : > { %s4888_s10 = scalar_lea.hbm %s5400_s2, %s4882_s23  ;;  %s4330_s1 = scalar_lea.hbm %s5400_s2, 256 }
  0xc3   : > { %s4325_s4 = scalar_lea.hbm %s4888_s10, 128  ;;  %p4331_p12 = scmp.lt.s32.totalorder %s4888_s10, %s5400_s2 }
  0xc4   : > { %p4326_p3 = scmp.ne.s32.totalorder %s4888_s10, %s4325_s4  ;;  %p4332_p1 = scmp.lt.s32.totalorder %s4330_s1, %s4325_s4 }
  0xc6   : > { %p4328_p5 = pnand %p4326_p3, %p4812_p11  ;;  %p4333_p4 = por %p4332_p1, %p4331_p12 }
  0xc8   : > { %p4329_p10 = pneg %p4328_p5 }
  0xca   : > { %p4334_p7 = pnand %p4333_p4, %p4329_p10 }
  0xcc   : > { %4337 = shalt.err (!%p4334_p7)
}
  0xcd   : > { %s4338_s7 = scalar_lea.vmem %s820_s26, 128  ;;  %s4516_s25 = smov [#allocation2]  }
  0xce   : > { %p4339_p6 = scmp.ne.s32.totalorder %s820_s26, %s4338_s7  ;;  %s4343_s19 = sshll.u32 %s4516_s25, 4  ;;  %s4344_s19 = int_to_ptr.vmem [resolvable:$false] %s4343_s19 }
  0xcf   : > { %s4345_s16 = scalar_lea.vmem %s4344_s19, 256  ;;  %p4346_p8 = scmp.lt.s32.totalorder %s820_s26, %s4344_s19 }
  0xd0   : > { %p4341_p0 = pnand %p4339_p6, %p4812_p11  ;;  %p4347_p2 = scmp.lt.s32.totalorder %s4345_s16, %s4338_s7 }
  0xd2   : > { %p4342_p13 = pneg %p4341_p0  ;;  %p4348_p3 = por %p4347_p2, %p4346_p8 }
  0xd4   : > { %p4349_p5 = pnand %p4348_p3, %p4342_p13 }
  0xd6   : > { %4352 = shalt.err (!%p4349_p5)
}
  0xd7   : > { %3849 = dma.hbm_to_vmem [thread:$0]  (!%p4790_p9), %s4888_s10, 128, %s820_s26, %s809_s8  }
  0xd8   : > { %s5401_s21 = sld [smem:[#allocation40_spill]]  ;;  %s851_s18 = scalar_lea.vmem [#allocation7], %s4879_s6 }
  0xd9   : > { %s858_s9 = sshll.u32 %s851_s18, 4  ;;  %s859_s9 = int_to_ptr.vmem [resolvable:$true] %s858_s9 }
  0xde   : > { %s856_s1 = scalar_lea.hbm %s5401_s21, %s4882_s23  ;;  %s4358_s19 = scalar_lea.hbm %s5401_s21, 256 }
  0xdf   : > { %s4353_s25 = scalar_lea.hbm %s856_s1, 128  ;;  %p4359_p4 = scmp.lt.s32.totalorder %s856_s1, %s5401_s21 }
  0xe0   : > { %p4354_p10 = scmp.ne.s32.totalorder %s856_s1, %s4353_s25  ;;  %p4360_p7 = scmp.lt.s32.totalorder %s4358_s19, %s4353_s25 }
  0xe2   : > { %p4356_p12 = pnand %p4354_p10, %p4812_p11  ;;  %p4361_p6 = por %p4360_p7, %p4359_p4 }
  0xe4   : > { %p4357_p1 = pneg %p4356_p12 }
  0xe6   : > { %p4362_p0 = pnand %p4361_p6, %p4357_p1 }
  0xe8   : > { %4365 = shalt.err (!%p4362_p0)
}
  0xe9   : > { %s4366_s10 = scalar_lea.vmem %s859_s9, 128  ;;  %s4517_s26 = smov [#allocation7]  }
  0xea   : > { %p4367_p13 = scmp.ne.s32.totalorder %s859_s9, %s4366_s10  ;;  %s4371_s8 = sshll.u32 %s4517_s26, 4  ;;  %s4372_s8 = int_to_ptr.vmem [resolvable:$false] %s4371_s8 }
  0xeb   : > { %s4373_s4 = scalar_lea.vmem %s4372_s8, 256  ;;  %p4374_p3 = scmp.lt.s32.totalorder %s859_s9, %s4372_s8 }
  0xec   : > { %p4369_p8 = pnand %p4367_p13, %p4812_p11  ;;  %p4375_p5 = scmp.lt.s32.totalorder %s4373_s4, %s4366_s10 }
  0xee   : > { %p4370_p2 = pneg %p4369_p8  ;;  %p4376_p10 = por %p4375_p5, %p4374_p3 }
  0xf0   : > { %p4377_p12 = pnand %p4376_p10, %p4370_p2 }
  0xf2   : > { %4380 = shalt.err (!%p4377_p12)
}
  0xf3   : > { %3855 = dma.hbm_to_vmem [thread:$0]  (!%p4790_p9), %s856_s1, 128, %s859_s9, %s4806_s5  }
  0xf4   : > { %s5402_s14 = sld [smem:[#allocation41_spill]]  ;;  %s869_s25 = scalar_lea.vmem [#allocation8], %s4879_s6 }
  0xf5   : > { %s876_s16 = sshll.u32 %s869_s25, 4  ;;  %s5403_s7 = sand.u32 1, %s4501_s28   ;;  %s877_s16 = int_to_ptr.vmem [resolvable:$true] %s876_s16 }
  0xf6   : > { %s866_s19 = scalar_lea.sflag [#allocation9], %s5403_s7 }
  0xfa   : > { %s4930_s18 = scalar_lea.hbm %s5402_s14, %s4882_s23  ;;  %s4386_s1 = scalar_lea.hbm %s5402_s14, 256 }
  0xfb   : > { %s4381_s10 = scalar_lea.hbm %s4930_s18, 128  ;;  %p4387_p6 = scmp.lt.s32.totalorder %s4930_s18, %s5402_s14 }
  0xfc   : > { %p4382_p1 = scmp.ne.s32.totalorder %s4930_s18, %s4381_s10  ;;  %p4388_p0 = scmp.lt.s32.totalorder %s4386_s1, %s4381_s10 }
  0xfe   : > { %p4384_p4 = pnand %p4382_p1, %p4812_p11  ;;  %p4389_p13 = por %p4388_p0, %p4387_p6 }
 0x100   : > { %p4385_p7 = pneg %p4384_p4 }
 0x102   : > { %p4390_p8 = pnand %p4389_p13, %p4385_p7 }
 0x104   : > { %4393 = shalt.err (!%p4390_p8)
}
 0x105   : > { %s4394_s6 = scalar_lea.vmem %s877_s16, 128  ;;  %s4518_s8 = smov [#allocation8]  }
 0x106   : > { %p4395_p2 = scmp.ne.s32.totalorder %s877_s16, %s4394_s6  ;;  %s4399_s4 = sshll.u32 %s4518_s8, 4  ;;  %s4400_s4 = int_to_ptr.vmem [resolvable:$false] %s4399_s4 }
 0x107   : > { %s4401_s22 = scalar_lea.vmem %s4400_s4, 256  ;;  %p4402_p10 = scmp.lt.s32.totalorder %s877_s16, %s4400_s4 }
 0x108   : > { %p4397_p3 = pnand %p4395_p2, %p4812_p11  ;;  %p4403_p12 = scmp.lt.s32.totalorder %s4401_s22, %s4394_s6 }
 0x10a   : > { %p4398_p5 = pneg %p4397_p3  ;;  %p4404_p1 = por %p4403_p12, %p4402_p10 }
 0x10c   : > { %p4405_p4 = pnand %p4404_p1, %p4398_p5 }
 0x10e   : > { %4408 = shalt.err (!%p4405_p4)
}
 0x10f   : > { %3858 = dma.hbm_to_vmem [thread:$0]  (!%p4790_p9), %s4930_s18, 128, %s877_s16, %s866_s19  }
 0x110   : > { %p5404_p7 = scmp.ne.s32.totalorder %s5374_s0, 0 }
 0x111   : > { %s4954_s27 = sand.u32 (!%p5404_p7), 1, %s4493_s3   ;;  %p5405_p11 = scmp.ne.s32.totalorder (!%p5404_p7), %s5383_s20, 0 }
 0x112   : > { %885 = sbr.rel (%p5404_p7) target bundleno = 4413 (0x113d), region = 124  ;;  %s4957_s2 = sshll.u32 (!%p5404_p7), %s4954_s27, 3 }
 0x113   : > { %s888_s25 = scalar_lea.sflag (!%p5404_p7), [#allocation3], %s4954_s27  ;;  %s891_s7 = scalar_lea.vmem (!%p5404_p7), [#allocation2], %s4957_s2 }
 0x117   : > { %4452 = dma.done.wait (%p5405_p11), %s888_s25, 128  }
 0x118   : > { %4454 = vsyncadd (%p5405_p11), %s888_s25, 4294967168  ;;  %s896_s0 = sand.u32 1, %s4682_s29   ;;  %s3373_s30 = sshll.u32 %s4954_s27, 4 }
 0x119   : > { %s897_s18 = scalar_lea.sflag [#allocation6], %s896_s0  ;;  %s4967_s16 = scalar_lea.vmem [#allocation5], %s3373_s30 }
 0x11a   : > { %4456 = dma.done.wait (%p5405_p11), %s897_s18, 384  }
 0x11b   : > { %4458 = vsyncadd (%p5405_p11), %s897_s18, 4294966912  ;;  %s909_s19 = scalar_lea.vmem [#allocation7], %s4957_s2  ;;  %s915_s10 = scalar_lea.sflag [#allocation9], %s896_s0 }
 0x11c   : > { %s918_s26 = scalar_lea.vmem [#allocation8], %s4957_s2 }
 0x11d   : > { %4460 = dma.done.wait (%p5405_p11), %s915_s10, 128  }
 0x11e   : > { %4462 = vsyncadd (%p5405_p11), %s915_s10, 4294967168  ;;  %p5406_p9 = scmp.eq.s32.totalorder %s4682_s29, 0 }
 0x120   : > { %4464 = dma.done.wait (%p5406_p9), [#allocation9], 1024   ;;  %p5407_p6 = pmov %p5406_p9 }
 0x122   : > { %4466 = vsyncadd (%p5407_p6), [#allocation9], 4294966272  ;;  %p5408_p0 = pmov %p5407_p6 }
 0x124   : > { %4468 = dma.done.wait (%p5408_p0), [#allocation12], 3072   ;;  %p5409_p13 = pmov %p5408_p0 }
 0x125   : > { %p5410_p8 = pmov %p5408_p0 }
 0x126   : > { %4470 = vsyncadd (%p5409_p13), [#allocation12], 4294964224 }
 0x127   : > { %4472 = dma.done.wait (%p5410_p8), [#allocation15], 3072   ;;  %p5411_p2 = pmov %p5408_p0 }
 0x128   : > { %p5412_p3 = pmov %p5408_p0 }
 0x129   : > { %4474 = vsyncadd (%p5411_p2), [#allocation15], 4294964224 }
 0x12a   : > { %4476 = dma.done.wait (%p5412_p3), [#allocation18], 3072   ;;  %p5413_p5 = pmov %p5408_p0 }
 0x12b   : > { %p5414_p10 = pmov %p5408_p0 }
 0x12c   : > { %4478 = vsyncadd (%p5413_p5), [#allocation18], 4294964224 }
 0x12d   : > { %4480 = dma.done.wait (%p5414_p10), [#allocation21], 2048   ;;  %p5415_p12 = pmov %p5408_p0 }
 0x12e   : > { %v4999_v0 = vld [vmem:[%s891_s7] sm:$0xff]  ;;  %v4519_v4 = vmov 0.0   ;;  %v3935_v5 = vld [vmem:[#allocation11 + $0x64] ss:$8 sps:$4 sm:$0xff]   ;;  %v3938_v7 = vld [vmem:[#allocation11 + $0x60] ss:$8 sps:$4 sm:$0xff]   ;;  %v1215_v41 = vlaneseq }
 0x12f   : > { %4482 = vsyncadd (%p5415_p12), [#allocation21], 4294965248  ;;  %1042 = vadd.xlane.f32.xlu0 %v4999_v0  ;;  %v3931_v1 = vld [vmem:[#allocation11 + $0x74] ss:$8 sps:$4 sm:$0xff]   ;;  %v3934_v3 = vld [vmem:[#allocation11 + $0x70] ss:$8 sps:$4 sm:$0xff]   ;;  %3603 = vmatprep.subr.bf16.mxu0 %v4519_v4 }
 0x130   : > { %v3933_v2 = vld [vmem:[#allocation10 + $0x38] sm:$0xff]   ;;  %v3937_v6 = vld [vmem:[#allocation10 + $0x30] sm:$0xff]   ;;  %1305 = vmatprep.subr.bf16.mxu1 %v3931_v1  ;;  %v3941_v13 = vld [vmem:[#allocation10 + $0x28] sm:$0xff]   ;;  %vm4520_vm0 = vmmov 0   ;;  %v4521_v19 = vmov 0   ;;  %s5416_s1 = sld [smem:[#allocation42_spill]] }
 0x131   : > { %3604 = vmatpush3.bf16.msra.mxu0 %v3933_v2  ;;  %1306 = vmatpush1.bf16.msra.mxu1 %v3934_v3  ;;  %v3939_v12 = vld [vmem:[#allocation11 + $0x54] ss:$8 sps:$4 sm:$0xff]   ;;  %v3942_v14 = vld [vmem:[#allocation11 + $0x50] ss:$8 sps:$4 sm:$0xff]   ;;  %v3943_v15 = vld [vmem:[#allocation11 + $0x44] ss:$8 sps:$4 sm:$0xff]  }
 0x132   : > { %3605 = vmatprep.subr.bf16.mxu0 %v4519_v4  ;;  %1307 = vmatprep.subr.bf16.mxu1 %v3935_v5  ;;  %v3945_v16 = vld [vmem:[#allocation10 + $0x20] sm:$0xff]   ;;  %v3947_v18 = vld [vmem:[#allocation11 + $0x34] ss:$8 sps:$4 sm:$0xff]   ;;  %v3950_v21 = vld [vmem:[#allocation11 + $0x30] ss:$8 sps:$4 sm:$0xff]   ;;  %s5417_s6 = sld [smem:[#allocation43_spill]] }
 0x133   : > { %v3946_v17 = vld [vmem:[#allocation11 + $0x40] ss:$8 sps:$4 sm:$0xff]   ;;  %3619 = vmatprep.mubr.msk.bf16.mxu0 %vm4520_vm0, %v4519_v4  ;;  %1337 = vmatprep.mubr.bf16.mxu1 %v4521_v19  ;;  %v3949_v20 = vld [vmem:[#allocation10 + $0x18] sm:$0xff]   ;;  %v3951_v22 = vld [vmem:[#allocation11 + $0x24] ss:$8 sps:$4 sm:$0xff]   ;;  %v1216_v42 = vshrl.u32 %v1215_v41, 7 }
 0x134   : > { %v3953_v23 = vld [vmem:[#allocation10 + $0x10] sm:$0xff]   ;;  %v3954_v24 = vld [vmem:[#allocation11 + $0x20] ss:$8 sps:$4 sm:$0xff]   ;;  %v3959_v28 = vld [vmem:[#allocation11 + $0x4] ss:$8 sps:$4 sm:$0xff]   ;;  %s5418_s22 = sld [smem:[#allocation47_spill]] }
 0x135   : > { %3606 = vmatpush3.bf16.msra.mxu0 %v3937_v6  ;;  %1308 = vmatpush1.bf16.msra.mxu1 %v3938_v7  ;;  %v3955_v25 = vld [vmem:[#allocation11 + $0x14] ss:$8 sps:$4 sm:$0xff]   ;;  %v3957_v26 = vld [vmem:[#allocation10 + $0x8] sm:$0xff]   ;;  %v3958_v27 = vld [vmem:[#allocation11 + $0x10] ss:$8 sps:$4 sm:$0xff]   ;;  %v5026_v43 = vsub.s32 0, %v1216_v42 }
 0x136   : > { %3607 = vmatprep.subr.bf16.mxu0 %v4519_v4  ;;  %1309 = vmatprep.subr.bf16.mxu1 %v3939_v12  ;;  %v3961_v29 = vld [vmem:[#allocation10] sm:$0xff]   ;;  %v3385_v35 = vld [vmem:[%s5416_s1] ss:$0 sm:$0xff]  ;;  %v5031_v45 = vsub.s32 1, %v1216_v42  ;;  %s5419_s0 = sld [smem:[#allocation45_spill]]  ;;  %vm1370_vm1 = vcmask 261120  }
 0x137   : > { %v3962_v30 = vld [vmem:[#allocation11] ss:$8 sps:$4 sm:$0xff]   ;;  %vm1614_vm2 = vcmask 1043456   ;;  %s4522_s30 = smov 64   ;;  %s4523_s18 = smov 96   ;;  %vm1562_vm4 = vcmask 64512  }
 0x138   : > { %v3386_v37 = vld [vmem:[%s5417_s6] ss:$0 sm:$0xff]  ;;  %s4524_s10 = smov 32   ;;  %v1038_v12 = vld [vmem:[%s909_s19] sm:$0xff]  ;;  %vm1809_vm5 = vcmask 523264   ;;  %vm1811_vm6 = vcmask 785408  }
 0x139   : > { %3608 = vmatpush3.bf16.msra.mxu0 %v3941_v13  ;;  %1310 = vmatpush1.bf16.msra.mxu1 %v3942_v14  ;;  %vm1555_vm3 = vcmp.gt.f32.partialorder %v1038_v12, 0.0  ;;  %vm2435_vm8 = vcmask 130048   ;;  %s5420_s25 = sld [smem:[#allocation52_spill]]  ;;  %s3509_s8 = sshll.u32 %s4682_s29, 7 }
 0x13a   : > { %3609 = vmatprep.subr.bf16.mxu0 %v4519_v4  ;;  %1311 = vmatprep.subr.bf16.mxu1 %v3943_v15  ;;  %v1101_v44 = vld [vmem:[%s5418_s22] sm:$0x3]  ;;  %s5422_s19 = sld [smem:[#allocation54_spill]]  ;;  %s1033_s4 = scalar_lea.vmem [#allocation22], %s4957_s2 }
 0x13b   : > { %v1218_v46 = vrot.slane %v1101_v44, %v5026_v43  ;;  %v1222_v47 = vrot.slane %v1101_v44, %v5031_v45  ;;  %s5423_s5 = sld [smem:[#allocation56_spill]] }
 0x13c   : > { %v3387_v48 = vld [vmem:[%s5419_s0] ss:$0 sm:$0xff]  ;;  %s5424_s23 = sld [smem:[#allocation57_spill]] }
 0x13d   : > { %3610 = vmatpush3.bf16.msra.mxu0 %v3945_v16  ;;  %1312 = vmatpush1.bf16.msra.mxu1 %v3946_v17  ;;  %s5425_s6 = sld [smem:[#allocation36_spill]] }
 0x13e   : > { %3611 = vmatprep.subr.bf16.mxu0 %v4519_v4  ;;  %1313 = vmatprep.subr.bf16.mxu1 %v3947_v18  ;;  %s5426_s7 = sld [smem:[#allocation58_spill]] }
 0x141   : > { %3612 = vmatpush3.bf16.msra.mxu0 %v3949_v20  ;;  %1314 = vmatpush1.bf16.msra.mxu1 %v3950_v21 }
 0x142   : > { %3613 = vmatprep.subr.bf16.mxu0 %v4519_v4  ;;  %1315 = vmatprep.subr.bf16.mxu1 %v3951_v22 }
 0x143   : > { %p5428_p4 = scmp.ne.s32.totalorder %s5425_s6, 0 }
 0x144   : > { %s5427_s0 = smov %s5426_s7 }
 0x145   : > { %3614 = vmatpush3.bf16.msra.mxu0 %v3953_v23  ;;  %1316 = vmatpush1.bf16.msra.mxu1 %v3954_v24 }
 0x146   : > { %3615 = vmatprep.subr.bf16.mxu0 %v4519_v4  ;;  %1317 = vmatprep.subr.bf16.mxu1 %v3955_v25 }
 0x149   : > { %3616 = vmatpush3.bf16.msra.mxu0 %v3957_v26  ;;  %1318 = vmatpush1.bf16.msra.mxu1 %v3958_v27 }
 0x14a   : > { %3617 = vmatprep.subr.bf16.mxu0 %v4519_v4  ;;  %1319 = vmatprep.subr.bf16.mxu1 %v3959_v28 }
 0x14d   : > { %3618 = vmatpush3.bf16.msra.mxu0 %v3961_v29  ;;  %1320 = vmatpush1.bf16.msra.mxu1 %v3962_v30 }
 0x14e   : > { %3623 = vmatprep.subr.bf16.mxu1 %v4519_v4  ;;  %3647 = vmatprep.subr.bf16.mxu0 %v4519_v4 }
 0x1b8   : > { %v1043_v8 = vpop.xlane.xlu0 %1042 }
 0x1b9   : > { %v1045_v9 = vmul.f32 0.0078125, %v1043_v8 }
 0x1bb   : > { %v1046_v10 = vsub.f32 %v4999_v0, %v1045_v9 }
 0x1bd   : > { %v1047_v11 = vmul.f32 %v1046_v10, %v1046_v10 }
 0x1bf   : > { %1048 = vadd.xlane.f32.xlu0 %v1047_v11 }
 0x248   : > { %v1049_v31 = vpop.xlane.xlu0 %1048 }
 0x249   : > { %v1050_v32 = vmul.f32 0.0078125, %v1049_v31 }
 0x24b   : > { %v1051_v33 = vadd.f32 1e-05, %v1050_v32 }
 0x24d   : > { %4051 = vrsqrt.f32 %v1051_v33 }
 0x25a   : > { %v4052_v34 = vpop.eup %4051 }
 0x25b   : > { %v1053_v36 = vmul.f32 %v4052_v34, %v1046_v10 }
 0x25d   : > { %v1060_v38 = vmul.f32 %v3385_v35, %v1053_v36 }
 0x25f   : > { %v1067_v39 = vadd.f32 %v3386_v37, %v1060_v38 }
 0x261   : > { %v1119_v40 = vpack.c.bf16 %v1067_v39, %v1067_v39 }
 0x263   : > { %3620 = vmatmul.mubr.bf16.vlgmr.msra.gmra.mxu0 %v1119_v40  ;;  %1338 = vmatmul.mubr.bf16.vlgmr.msra.gmra.mxu1 %v1119_v40 }
 0x264   : > { %3625 = vmatprep.mubr.msk.bf16.mxu1 %vm4520_vm0, %v4519_v4  ;;  %3649 = vmatprep.mubr.msk.bf16.mxu0 %vm4520_vm0, %v4519_v4 }
 0x323   : > { %v1208_v49 = vpop.f32.mrf.mxu0  ;;  %v1339_v50 = vpop.f32.mrf.mxu1 }
 0x324   : > { %v1340_v51 = vadd.f32 %v1339_v50, %v1218_v46  ;;  %v1209_v54 = vadd.f32 %v3387_v48, %v1208_v49 }
 0x325   : > { %v3621_v52 = vpop.f32.mrf.mxu0  ;;  %v1341_v53 = vpop.f32.mrf.mxu1 }
 0x326   : > { %v1347_v55 = vpack.c.bf16 %v1340_v51, %v1340_v51  ;;  %v1342_v56 = vadd.f32 %v1341_v53, %v1222_v47  ;;  %v1346_v63 = vpack.c.bf16 %v1209_v54, %v1209_v54 }
 0x327   : > { %v1211_v57 = vpop.f32.mrf.mxu0  ;;  %v1343_v58 = vpop.f32.mrf.mxu1 }
 0x328   : > { %v5038_v59 = vpack.c.bf16 %v1342_v56, %v1342_v56  ;;  %1359 = vrot.lane.b32.xlu0 %v1347_v55, %s4522_s30  ;;  %1357 = vrot.lane.b32.xlu1 %v1347_v55, %s4523_s18  ;;  %v1375_v60 = vsel %vm1370_vm1, %v1347_v55, 0 }
 0x329   : > { %v3622_v61 = vpop.f32.mrf.mxu0  ;;  %v1344_v62 = vpop.f32.mrf.mxu1  ;;  %3624 = vmatpush3.bf16.xpose.msra.mxu1 %v1375_v60 }
 0x32a   : > { %v1616_v1 = vsel %vm1614_vm2, %v5038_v59, 0  ;;  %3629 = vmatprep.subr.bf16.mxu1 %v4519_v4 }
 0x32b   : > { %3648 = vmatpush3.bf16.msra.mxu0 %v1616_v1 }
 0x32c   : > { %1350 = vrot.lane.b32.xlu1 %v1346_v63, %s4523_s18  ;;  %3659 = vmatprep.subr.bf16.mxu0 %v4519_v4 }
 0x330   : > { %1352 = vrot.lane.b32.xlu1 %v1346_v63, %s4522_s30  ;;  %3626 = vmatmul.mubr.msk.bf16.vlgmr.msra.gmra.mxu1 %vm1370_vm1, %v1346_v63 }
 0x331   : > { %3631 = vmatprep.mubr.msk.bf16.mxu1 %vm4520_vm0, %v4519_v4 }
 0x334   : > { %1361 = vrot.lane.b32.xlu1 %v1347_v55, %s4524_s10 }
 0x338   : > { %1354 = vrot.lane.b32.xlu1 %v1346_v63, %s4524_s10 }
 0x39a   : > { %v1358_v2 = vpop.permute.xlu1 %1357  ;;  %v1360_v6 = vpop.permute.xlu0 %1359 }
 0x39b   : > { %v1421_v3 = vsel %vm1370_vm1, %v1358_v2, 0  ;;  %v1467_v8 = vsel %vm1370_vm1, %v1360_v6, 0 }
 0x39c   : > { %3630 = vmatpush3.bf16.xpose.msra.mxu1 %v1421_v3 }
 0x39d   : > { %3635 = vmatprep.subr.bf16.mxu1 %v4519_v4 }
 0x39e   : > { %v1351_v5 = vpop.permute.xlu1 %1350 }
 0x3a2   : > { %v1353_v7 = vpop.permute.xlu1 %1352 }
 0x3a3   : > { %3632 = vmatmul.mubr.msk.bf16.vlgmr.msra.gmra.mxu1 %vm1370_vm1, %v1351_v5 }
 0x3a4   : > { %3636 = vmatpush3.bf16.xpose.msra.mxu1 %v1467_v8  ;;  %3637 = vmatprep.mubr.msk.bf16.mxu1 %vm4520_vm0, %v4519_v4 }
 0x3a5   : > { %3641 = vmatprep.subr.bf16.mxu1 %v4519_v4 }
 0x3a6   : > { %v1362_v9 = vpop.permute.xlu1 %1361 }
 0x3a7   : > { %v1513_v10 = vsel %vm1370_vm1, %v1362_v9, 0 }
 0x3aa   : > { %v1355_v11 = vpop.permute.xlu1 %1354 }
 0x3ab   : > { %3638 = vmatmul.mubr.msk.bf16.vlgmr.msra.gmra.mxu1 %vm1370_vm1, %v1353_v7 }
 0x3ac   : > { %3642 = vmatpush3.bf16.xpose.msra.mxu1 %v1513_v10  ;;  %3643 = vmatprep.mubr.msk.bf16.mxu1 %vm4520_vm0, %v4519_v4 }
 0x3ad   : > { %3653 = vmatprep.subr.bf16.mxu1 %v4519_v4 }
 0x3b3   : > { %3644 = vmatmul.mubr.msk.bf16.vlgmr.msra.gmra.mxu1 %vm1370_vm1, %v1355_v11 }
 0x3b4   : > { %3655 = vmatprep.mubr.msk.bf16.mxu1 %vm4520_vm0, %v4519_v4 }
 0x3f0   : > { %v1411_v13 = vpop.f32.mrf.mxu1 }
 0x3f1   : > { %v1558_v14 = vsel %vm1555_vm3, -1e+30, %v1411_v13 }
 0x3f2   : > { %v3627_v15 = vpop.f32.mrf.mxu1  ;;  %v1563_v16 = vsel %vm1562_vm4, %v1558_v14, -inf }
 0x3f3   : > { %1564 = vmax.xlane.f32.xlu1 %v1563_v16 }
 0x3f4   : > { %v1414_v17 = vpop.f32.mrf.mxu1 }
 0x3f6   : > { %v3628_v18 = vpop.f32.mrf.mxu1 }
 0x463   : > { %v1457_v20 = vpop.f32.mrf.mxu1 }
 0x464   : > { %v1559_v21 = vsel %vm1555_vm3, -1e+30, %v1457_v20 }
 0x465   : > { %v3633_v22 = vpop.f32.mrf.mxu1  ;;  %v1566_v23 = vsel %vm1562_vm4, %v1559_v21, -inf }
 0x466   : > { %1567 = vmax.xlane.f32.xlu0 %v1566_v23 }
 0x467   : > { %v1460_v24 = vpop.f32.mrf.mxu1 }
 0x469   : > { %v3634_v25 = vpop.f32.mrf.mxu1 }
 0x46a   : > { %v3963_v25 = vld [vmem:[#allocation13 + $0x38] sm:$0xff]  }
 0x46b   : > { %v1503_v26 = vpop.f32.mrf.mxu1 }
 0x46c   : > { %v1560_v27 = vsel %vm1555_vm3, -1e+30, %v1503_v26  ;;  %v3964_v26 = vld [vmem:[#allocation13 + $0x30] sm:$0xff]  }
 0x46d   : > { %v3639_v28 = vpop.f32.mrf.mxu1  ;;  %v1569_v29 = vsel %vm1562_vm4, %v1560_v27, -inf }
 0x46e   : > { %1570 = vmax.xlane.f32.xlu1 %v1569_v29  ;;  %v3965_v29 = vld [vmem:[#allocation13 + $0x28] sm:$0xff]  }
 0x46f   : > { %v1506_v30 = vpop.f32.mrf.mxu1 }
 0x471   : > { %v3640_v31 = vpop.f32.mrf.mxu1 }
 0x473   : > { %v1549_v32 = vpop.f32.mrf.mxu1 }
 0x474   : > { %v1561_v33 = vsel %vm1555_vm3, -1e+30, %v1549_v32  ;;  %v3966_v32 = vld [vmem:[#allocation13 + $0x20] sm:$0xff]  }
 0x475   : > { %v3645_v34 = vpop.f32.mrf.mxu1  ;;  %v1572_v35 = vsel %vm1562_vm4, %v1561_v33, -inf }
 0x476   : > { %1573 = vmax.xlane.f32.xlu1 %v1572_v35  ;;  %v3967_v35 = vld [vmem:[#allocation13 + $0x18] sm:$0xff]  }
 0x477   : > { %v1552_v36 = vpop.f32.mrf.mxu1 }
 0x479   : > { %v3646_v37 = vpop.f32.mrf.mxu1 }
 0x47c   : > { %v1565_v38 = vpop.xlane.xlu1 %1564 }
 0x47d   : > { %v1575_v39 = vsub.f32 %v1558_v14, %v1565_v38  ;;  %v3968_v38 = vld [vmem:[#allocation13 + $0x10] sm:$0xff]  }
 0x47f   : > { %v1579_v40 = vmul.f32 1.442695, %v1575_v39  ;;  %v3969_v39 = vld [vmem:[#allocation13 + $0x8] sm:$0xff]  }
 0x481   : > { %4053 = vpow2.f32 %v1579_v40  ;;  %v3970_v40 = vld [vmem:[#allocation13] sm:$0xff]  }
 0x48e   : > { %v4054_v41 = vpop.eup %4053 }
 0x48f   : > { %v1587_v42 = vsel %vm1562_vm4, %v4054_v41, 0.0 }
 0x490   : > { %1588 = vadd.xlane.f32.xlu0 %v1587_v42 }
 0x4ef   : > { %v1568_v44 = vpop.xlane.xlu0 %1567 }
 0x4f0   : > { %v1576_v46 = vsub.f32 %v1559_v21, %v1568_v44 }
 0x4f2   : > { %v1581_v47 = vmul.f32 1.442695, %v1576_v46 }
 0x4f4   : > { %4055 = vpow2.f32 %v1581_v47 }
 0x4f7   : > { %v1571_v48 = vpop.xlane.xlu1 %1570 }
 0x4f8   : > { %v1577_v49 = vsub.f32 %v1560_v27, %v1571_v48 }
 0x4fa   : > { %v1583_v50 = vmul.f32 1.442695, %v1577_v49 }
 0x4fc   : > { %4057 = vpow2.f32 %v1583_v50 }
 0x4ff   : > { %v1574_v56 = vpop.xlane.xlu1 %1573 }
 0x500   : > { %v1578_v57 = vsub.f32 %v1561_v33, %v1574_v56 }
 0x501   : > { %v4056_v51 = vpop.eup %4055 }
 0x502   : > { %v1590_v52 = vsel %vm1562_vm4, %v4056_v51, 0.0  ;;  %v1585_v58 = vmul.f32 1.442695, %v1578_v57 }
 0x503   : > { %1591 = vadd.xlane.f32.xlu1 %v1590_v52 }
 0x509   : > { %v4058_v53 = vpop.eup %4057 }
 0x50a   : > { %v1593_v54 = vsel %vm1562_vm4, %v4058_v53, 0.0 }
 0x50b   : > { %1594 = vadd.xlane.f32.xlu0 %v1593_v54  ;;  %v3420_v54 = vld [vmem:[%s5304_s11] ss:$0 sm:$0xff] }
 0x514   : > { %1366 = vrot.lane.b32.xlu1 %v5038_v59, %s4522_s30 }
 0x519   : > { %v1589_v55 = vpop.xlane.xlu0 %1588 }
 0x51a   : > { %4059 = vrcp.f32 %v1589_v55 }
 0x51b   : > { %4061 = vpow2.f32 %v1585_v58 }
 0x521   : > { %1364 = vrot.lane.b32.xlu0 %v5038_v59, %s4523_s18 }
 0x527   : > { %v4060_v60 = vpop.eup %4059 }
 0x528   : > { %v1603_v61 = vmul.f32 %v4060_v60, %v4054_v41  ;;  %v4062_v63 = vpop.eup %4061 }
 0x529   : > { %v1596_v1 = vsel %vm1562_vm4, %v4062_v63, 0.0 }
 0x52a   : > { %v1607_v62 = vpack.c.bf16 %v1603_v61, %v1603_v61 }
 0x52c   : > { %3650 = vmatmul.mubr.msk.bf16.vlgmr.msra.gmra.mxu0 %vm1562_vm4, %v1607_v62  ;;  %v3971_v62 = vld [vmem:[#allocation16 + $0x70] ss:$8 sps:$4 sm:$0xff]  }
 0x52d   : > { %3661 = vmatprep.mubr.msk.bf16.mxu0 %vm4520_vm0, %v4519_v4 }
 0x538   : > { %1597 = vadd.xlane.f32.xlu1 %v1596_v1  ;;  %v3976_v1 = vld [vmem:[#allocation16 + $0x64] ss:$8 sps:$4 sm:$0xff]  }
 0x549   : > { %1368 = vrot.lane.b32.xlu1 %v5038_v59, %s4524_s10 }
 0x58c   : > { %v1592_v2 = vpop.xlane.xlu1 %1591 }
 0x58d   : > { %4063 = vrcp.f32 %v1592_v2  ;;  %v3974_v2 = vld [vmem:[#allocation16 + $0x60] ss:$8 sps:$4 sm:$0xff]  }
 0x590   : > { %v1367_v3 = vpop.permute.xlu1 %1366 }
 0x591   : > { %v1708_v5 = vsel %vm1614_vm2, %v1367_v3, 0  ;;  %v3986_v3 = vld [vmem:[#allocation14 + $0x38] sm:$0xff]  }
 0x592   : > { %3660 = vmatpush3.bf16.msra.mxu0 %v1708_v5  ;;  %v3979_v5 = vld [vmem:[#allocation16 + $0x54] ss:$8 sps:$4 sm:$0xff]  }
 0x593   : > { %3671 = vmatprep.subr.bf16.mxu0 %v4519_v4 }
 0x594   : > { %v1595_v6 = vpop.xlane.xlu0 %1594 }
 0x595   : > { %4065 = vrcp.f32 %v1595_v6  ;;  %v3990_v6 = vld [vmem:[#allocation14 + $0x30] sm:$0xff]  }
 0x598   : > { %v1365_v7 = vpop.permute.xlu0 %1364 }
 0x599   : > { %v1662_v8 = vsel %vm1614_vm2, %v1365_v7, 0  ;;  %v3982_v7 = vld [vmem:[#allocation16 + $0x44] ss:$8 sps:$4 sm:$0xff]  }
 0x59a   : > { %v4064_v9 = vpop.eup %4063  ;;  %3654 = vmatpush3.bf16.msra.mxu1 %v1662_v8  ;;  %v3980_v8 = vld [vmem:[#allocation16 + $0x40] ss:$8 sps:$4 sm:$0xff]  }
 0x59b   : > { %v1604_v10 = vmul.f32 %v4064_v9, %v4056_v51  ;;  %3665 = vmatprep.subr.bf16.mxu1 %v4519_v4  ;;  %v3985_v9 = vld [vmem:[#allocation16 + $0x34] ss:$8 sps:$4 sm:$0xff]  }
 0x59d   : > { %v1608_v11 = vpack.c.bf16 %v1604_v10, %v1604_v10  ;;  %v3983_v10 = vld [vmem:[#allocation16 + $0x30] ss:$8 sps:$4 sm:$0xff]  }
 0x59f   : > { %3656 = vmatmul.mubr.msk.bf16.vlgmr.msra.gmra.mxu1 %vm1562_vm4, %v1608_v11  ;;  %v3989_v11 = vld [vmem:[#allocation16 + $0x24] ss:$8 sps:$4 sm:$0xff]  }
 0x5a0   : > { %3667 = vmatprep.mubr.msk.bf16.mxu1 %vm4520_vm0, %v4519_v4 }
 0x5a2   : > { %v4066_v59 = vpop.eup %4065 }
 0x5a3   : > { %v1605_v12 = vmul.f32 %v4066_v59, %v4058_v53  ;;  %v3987_v59 = vld [vmem:[#allocation16 + $0x20] ss:$8 sps:$4 sm:$0xff]  }
 0x5a5   : > { %v1609_v13 = vpack.c.bf16 %v1605_v12, %v1605_v12 }
 0x5a7   : > { %3662 = vmatmul.mubr.msk.bf16.vlgmr.msra.gmra.mxu0 %vm1562_vm4, %v1609_v13 }
 0x5a8   : > { %3687 = vmatprep.mubr.msk.bf16.mxu0 %vm4520_vm0, %v4519_v4  ;;  %3672 = vmatpush3.bf16.msra.mxu0 %v3963_v25 }
 0x5a9   : > { %3673 = vmatprep.subr.bf16.mxu0 %v4519_v4 }
 0x5ac   : > { %3674 = vmatpush3.bf16.msra.mxu0 %v3964_v26  ;;  %v3999_v26 = vld [vmem:[#allocation14 + $0x18] sm:$0xff]  }
 0x5ad   : > { %3675 = vmatprep.subr.bf16.mxu0 %v4519_v4 }
 0x5b0   : > { %3676 = vmatpush3.bf16.msra.mxu0 %v3965_v29  ;;  %v4002_v29 = vld [vmem:[#allocation14] sm:$0xff]  }
 0x5b1   : > { %3677 = vmatprep.subr.bf16.mxu0 %v4519_v4 }
 0x5b4   : > { %3678 = vmatpush3.bf16.msra.mxu0 %v3966_v32 }
 0x5b5   : > { %3679 = vmatprep.subr.bf16.mxu0 %v4519_v4 }
 0x5b8   : > { %3680 = vmatpush3.bf16.msra.mxu0 %v3967_v35 }
 0x5b9   : > { %3681 = vmatprep.subr.bf16.mxu0 %v4519_v4 }
 0x5bc   : > { %3682 = vmatpush3.bf16.msra.mxu0 %v3968_v38 }
 0x5bd   : > { %3683 = vmatprep.subr.bf16.mxu0 %v4519_v4 }
 0x5c0   : > { %3684 = vmatpush3.bf16.msra.mxu0 %v3969_v39 }
 0x5c1   : > { %v1598_v14 = vpop.xlane.xlu1 %1597  ;;  %3685 = vmatprep.subr.bf16.mxu0 %v4519_v4 }
 0x5c2   : > { %4067 = vrcp.f32 %v1598_v14 }
 0x5c4   : > { %3686 = vmatpush3.bf16.msra.mxu0 %v3970_v40  ;;  %v1969_v40 = vld [vmem:[%s5310_s17] sm:$0x3] }
 0x5c5   : > { %v1369_v15 = vpop.permute.xlu1 %1368 }
 0x5c6   : > { %v1754_v16 = vsel %vm1614_vm2, %v1369_v15, 0 }
 0x5c7   : > { %3666 = vmatpush3.bf16.msra.mxu1 %v1754_v16  ;;  %v3993_v16 = vld [vmem:[#allocation16 + $0x14] ss:$8 sps:$4 sm:$0xff]  }
 0x5c8   : > { %3691 = vmatprep.subr.bf16.mxu1 %v4519_v4 }
 0x5cf   : > { %v4068_v17 = vpop.eup %4067 }
 0x5d0   : > { %v1606_v18 = vmul.f32 %v4068_v17, %v4062_v63  ;;  %v3973_v63 = vld [vmem:[#allocation16 + $0x74] ss:$8 sps:$4 sm:$0xff]   ;;  %v3991_v17 = vld [vmem:[#allocation16 + $0x10] ss:$8 sps:$4 sm:$0xff]  }
 0x5d1   : > { %2174 = vmatprep.subr.bf16.mxu0 %v3973_v63 }
 0x5d2   : > { %v1610_v20 = vpack.c.bf16 %v1606_v18, %v1606_v18  ;;  %v3994_v18 = vld [vmem:[#allocation14 + $0x28] sm:$0xff]  }
 0x5d4   : > { %3668 = vmatmul.mubr.msk.bf16.vlgmr.msra.gmra.mxu1 %vm1562_vm4, %v1610_v20  ;;  %v3997_v20 = vld [vmem:[#allocation16 + $0x4] ss:$8 sps:$4 sm:$0xff]  }
 0x5d5   : > { %3707 = vmatprep.mubr.msk.bf16.mxu1 %vm4520_vm0, %v4519_v4  ;;  %3692 = vmatpush3.bf16.msra.mxu1 %v3986_v3 }
 0x5d6   : > { %3693 = vmatprep.subr.bf16.mxu1 %v4519_v4 }
 0x5d9   : > { %3694 = vmatpush3.bf16.msra.mxu1 %v3990_v6 }
 0x5da   : > { %3695 = vmatprep.subr.bf16.mxu1 %v4519_v4 }
 0x5dd   : > { %3696 = vmatpush3.bf16.msra.mxu1 %v3994_v18 }
 0x5de   : > { %3697 = vmatprep.subr.bf16.mxu1 %v4519_v4 }
 0x5ec   : > { %v1652_v21 = vpop.f32.mrf.mxu0 }
 0x5ee   : > { %v3651_v22 = vpop.f32.mrf.mxu0 }
 0x5ef   : > { %v3998_v22 = vld [vmem:[#allocation14 + $0x20] sm:$0xff]  }
 0x5f0   : > { %v1655_v23 = vpop.f32.mrf.mxu0  ;;  %3698 = vmatpush3.bf16.msra.mxu1 %v3998_v22 }
 0x5f1   : > { %v1036_v23 = vld [vmem:[%s4967_s16] sm:$0xff]  ;;  %3699 = vmatprep.subr.bf16.mxu1 %v4519_v4 }
 0x5f2   : > { %v3652_v24 = vpop.f32.mrf.mxu0 }
 0x5f3   : > { %v1037_v24 = vld [vmem:[%s4967_s16 + $0x8] sm:$0xff] }
 0x5f4   : > { %v2082_v25 = vpack.c.bf16 %v1037_v24, %v1036_v23  ;;  %3700 = vmatpush3.bf16.msra.mxu1 %v3999_v26 }
 0x5f5   : > { %3701 = vmatprep.subr.bf16.mxu1 %v4519_v4 }
 0x65f   : > { %v1698_v27 = vpop.f32.mrf.mxu1 }
 0x660   : > { %1797 = vrot.lane.b32.xlu0 %v1698_v27, %s4524_s10  ;;  %v4000_v27 = vld [vmem:[#allocation14 + $0x10] sm:$0xff]  }
 0x661   : > { %v3657_v28 = vpop.f32.mrf.mxu1  ;;  %3702 = vmatpush3.bf16.msra.mxu1 %v4000_v27 }
 0x662   : > { %v4001_v28 = vld [vmem:[#allocation14 + $0x8] sm:$0xff]   ;;  %3703 = vmatprep.subr.bf16.mxu1 %v4519_v4 }
 0x663   : > { %v1701_v30 = vpop.f32.mrf.mxu1 }
 0x665   : > { %v3658_v31 = vpop.f32.mrf.mxu1  ;;  %3704 = vmatpush3.bf16.msra.mxu1 %v4001_v28 }
 0x666   : > { %3705 = vmatprep.subr.bf16.mxu1 %v4519_v4 }
 0x667   : > { %v1744_v33 = vpop.f32.mrf.mxu0 }
 0x668   : > { %1801 = vrot.lane.b32.xlu1 %v1744_v33, %s4522_s30 }
 0x669   : > { %v3663_v34 = vpop.f32.mrf.mxu0  ;;  %3706 = vmatpush3.bf16.msra.mxu1 %v4002_v29 }
 0x66a   : > { %3711 = vmatprep.subr.bf16.mxu1 %v4519_v4  ;;  %v3429_v34 = vld [vmem:[%s5305_s12] ss:$0 sm:$0xff] }
 0x66b   : > { %v1747_v36 = vpop.f32.mrf.mxu0 }
 0x66c   : > { %v3430_v36 = vld [vmem:[%s5306_s13] ss:$0 sm:$0xff] }
 0x66d   : > { %v3664_v37 = vpop.f32.mrf.mxu0 }
 0x694   : > { %v1790_v41 = vpop.f32.mrf.mxu1 }
 0x695   : > { %1805 = vrot.lane.b32.xlu0 %v1790_v41, %s4523_s18  ;;  %v2087_v41 = vrot.slane %v1969_v40, %v5026_v43 }
 0x696   : > { %v3669_v42 = vpop.f32.mrf.mxu1 }
 0x698   : > { %v1793_v44 = vpop.f32.mrf.mxu1 }
 0x699   : > { %v2091_v44 = vrot.slane %v1969_v40, %v5031_v45 }
 0x69a   : > { %v3670_v46 = vpop.f32.mrf.mxu1 }
 0x6d2   : > { %v1798_v47 = vpop.permute.xlu0 %1797 }
 0x6d3   : > { %v1808_v49 = vsel %vm1370_vm1, %v1652_v21, %v1798_v47  ;;  %v3995_v21 = vld [vmem:[#allocation16] ss:$8 sps:$4 sm:$0xff]  }
 0x6da   : > { %v1802_v48 = vpop.permute.xlu1 %1801 }
 0x6db   : > { %v1810_v50 = vsel %vm1809_vm5, %v1808_v49, %v1802_v48 }
 0x707   : > { %v1806_v51 = vpop.permute.xlu0 %1805 }
 0x708   : > { %v1812_v52 = vsel %vm1811_vm6, %v1810_v50, %v1806_v51 }
 0x709   : > { %v1813_v53 = vpack.c.bf16 %v1812_v52, %v1812_v52 }
 0x70b   : > { %3688 = vmatmul.mubr.bf16.vlgmr.msra.gmra.mxu0 %v1813_v53 }
 0x70c   : > { %2206 = vmatprep.mubr.bf16.mxu0 %v4521_v19  ;;  %2175 = vmatpush1.bf16.msra.mxu0 %v3971_v62 }
 0x70d   : > { %2176 = vmatprep.subr.bf16.mxu0 %v3976_v1 }
 0x710   : > { %2177 = vmatpush1.bf16.msra.mxu0 %v3974_v2 }
 0x711   : > { %2178 = vmatprep.subr.bf16.mxu0 %v3979_v5 }
 0x7cb   : > { %v1902_v55 = vpop.f32.mrf.mxu0 }
 0x7cc   : > { %v1903_v56 = vadd.f32 %v3420_v54, %v1902_v55 }
 0x7cd   : > { %v3689_v57 = vpop.f32.mrf.mxu0 }
 0x7ce   : > { %v5125_v58 = vadd.f32 %v1903_v56, %v4999_v0  ;;  %v3977_v0 = vld [vmem:[#allocation16 + $0x50] ss:$8 sps:$4 sm:$0xff]  }
 0x7cf   : > { %v1905_v60 = vpop.f32.mrf.mxu0  ;;  %2179 = vmatpush1.bf16.msra.mxu0 %v3977_v0  ;;  %v3431_v56 = vld [vmem:[%s5308_s15] ss:$0 sm:$0xff] }
 0x7d0   : > { %1911 = vadd.xlane.f32.xlu1 %v5125_v58  ;;  %2180 = vmatprep.subr.bf16.mxu0 %v3982_v7 }
 0x7d1   : > { %v3690_v61 = vpop.f32.mrf.mxu0 }
 0x7d3   : > { %2181 = vmatpush1.bf16.msra.mxu0 %v3980_v8 }
 0x7d4   : > { %2182 = vmatprep.subr.bf16.mxu0 %v3985_v9 }
 0x7d7   : > { %2183 = vmatpush1.bf16.msra.mxu0 %v3983_v10 }
 0x7d8   : > { %2184 = vmatprep.subr.bf16.mxu0 %v3989_v11  ;;  %v1039_v11 = vld [vmem:[%s918_s26] sm:$0xff]  ;;  %s3139_s26 = sshll.u32 %s1033_s4, 4  ;;  %s3140_s26 = int_to_ptr.vmem [resolvable:$true] %s3139_s26 }
 0x7d9   : > { %vm2428_vm7 = vcmp.gt.f32.partialorder %v1039_v11, 0.0 }
 0x7db   : > { %2185 = vmatpush1.bf16.msra.mxu0 %v3987_v59 }
 0x7dc   : > { %2186 = vmatprep.subr.bf16.mxu0 %v3993_v16 }
 0x7df   : > { %2187 = vmatpush1.bf16.msra.mxu0 %v3991_v17 }
 0x7e0   : > { %2188 = vmatprep.subr.bf16.mxu0 %v3997_v20 }
 0x7e3   : > { %2189 = vmatpush1.bf16.msra.mxu0 %v3995_v21 }
 0x7e4   : > { %3735 = vmatprep.subr.bf16.mxu0 %v4519_v4 }
 0x7e6   : > { %2207 = vmatmul.mubr.bf16.vlgmr.msra.gmra.mxu0 %v2082_v25 }
 0x7e7   : > { %3737 = vmatprep.mubr.msk.bf16.mxu0 %vm4520_vm0, %v4519_v4 }
 0x859   : > { %v1912_v12 = vpop.xlane.xlu1 %1911 }
 0x85a   : > { %v1913_v13 = vmul.f32 0.0078125, %v1912_v12 }
 0x85c   : > { %v1914_v14 = vsub.f32 %v5125_v58, %v1913_v13 }
 0x85e   : > { %v1915_v15 = vmul.f32 %v1914_v14, %v1914_v14 }
 0x860   : > { %1916 = vadd.xlane.f32.xlu0 %v1915_v15 }
 0x8a6   : > { %v2208_v42 = vpop.f32.mrf.mxu0 }
 0x8a7   : > { %v2209_v47 = vadd.f32 %v2208_v42, %v2087_v41 }
 0x8a8   : > { %v2210_v46 = vpop.f32.mrf.mxu0 }
 0x8a9   : > { %v2211_v49 = vadd.f32 %v2210_v46, %v2091_v44 }
 0x8aa   : > { %v2212_v48 = vpop.f32.mrf.mxu0 }
 0x8ab   : > { %v2213_v50 = vadd.f32 %v2212_v48, %v2087_v41 }
 0x8ac   : > { %v2214_v51 = vpop.f32.mrf.mxu0 }
 0x8ad   : > { %v2218_v52 = vpack.c.bf16 %v2213_v50, %v2209_v47  ;;  %v2215_v53 = vadd.f32 %v2214_v51, %v2091_v44 }
 0x8af   : > { %v5155_v54 = vpack.c.bf16 %v2215_v53, %v2211_v49  ;;  %2228 = vrot.lane.b32.xlu0 %v2218_v52, %s4523_s18  ;;  %v2248_v55 = vsel %vm1370_vm1, %v2218_v52, 0 }
 0x8b1   : > { %3736 = vmatpush3.bf16.msra.mxu0 %v5155_v54 }
 0x8b2   : > { %3747 = vmatprep.subr.bf16.mxu0 %v4519_v4 }
 0x8e9   : > { %v1917_v30 = vpop.xlane.xlu0 %1916 }
 0x8ea   : > { %v1918_v31 = vmul.f32 0.0078125, %v1917_v30 }
 0x8ec   : > { %v1919_v32 = vadd.f32 1e-05, %v1918_v31 }
 0x8ee   : > { %4069 = vrsqrt.f32 %v1919_v32 }
 0x8fb   : > { %v4070_v33 = vpop.eup %4069 }
 0x8fc   : > { %v1921_v35 = vmul.f32 %v4070_v33, %v1914_v14 }
 0x8fe   : > { %v1928_v37 = vmul.f32 %v3429_v34, %v1921_v35 }
 0x900   : > { %v1935_v38 = vadd.f32 %v3430_v36, %v1928_v37 }
 0x902   : > { %v1987_v39 = vpack.c.bf16 %v1935_v38, %v1935_v38 }
 0x904   : > { %3708 = vmatmul.mubr.bf16.vlgmr.msra.gmra.mxu1 %v1987_v39 }
 0x905   : > { %3713 = vmatprep.mubr.msk.bf16.mxu1 %vm4520_vm0, %v4519_v4  ;;  %3712 = vmatpush3.bf16.xpose.msra.mxu1 %v2248_v55 }
 0x906   : > { %3717 = vmatprep.subr.bf16.mxu1 %v4519_v4 }
 0x921   : > { %v2229_v61 = vpop.permute.xlu0 %2228 }
 0x922   : > { %v2294_v2 = vsel %vm1370_vm1, %v2229_v61, 0 }
 0x9c4   : > { %v2076_v57 = vpop.f32.mrf.mxu1 }
 0x9c5   : > { %v2077_v60 = vadd.f32 %v3431_v56, %v2076_v57 }
 0x9c6   : > { %v3709_v62 = vpop.f32.mrf.mxu1 }
 0x9c7   : > { %v2217_v63 = vpack.c.bf16 %v2077_v60, %v2077_v60 }
 0x9c8   : > { %v2079_v1 = vpop.f32.mrf.mxu1 }
 0x9c9   : > { %2221 = vrot.lane.b32.xlu1 %v2217_v63, %s4523_s18  ;;  %2223 = vrot.lane.b32.xlu0 %v2217_v63, %s4522_s30 }
 0x9ca   : > { %3714 = vmatmul.mubr.msk.bf16.vlgmr.msra.gmra.mxu1 %vm1370_vm1, %v2217_v63  ;;  %v3710_v3 = vpop.f32.mrf.mxu1 }
 0x9cb   : > { %3718 = vmatpush3.bf16.xpose.msra.mxu1 %v2294_v2  ;;  %3719 = vmatprep.mubr.msk.bf16.mxu1 %vm4520_vm0, %v4519_v4 }
 0x9cc   : > { %3723 = vmatprep.subr.bf16.mxu1 %v4519_v4 }
 0x9cd   : > { %2230 = vrot.lane.b32.xlu1 %v2218_v52, %s4522_s30  ;;  %2225 = vrot.lane.b32.xlu0 %v2217_v63, %s4524_s10 }
 0x9d1   : > { %2232 = vrot.lane.b32.xlu1 %v2218_v52, %s4524_s10 }
 0xa3b   : > { %v2222_v5 = vpop.permute.xlu1 %2221  ;;  %v2224_v8 = vpop.permute.xlu0 %2223 }
 0xa3c   : > { %3720 = vmatmul.mubr.msk.bf16.vlgmr.msra.gmra.mxu1 %vm1370_vm1, %v2222_v5 }
 0xa3d   : > { %3725 = vmatprep.mubr.msk.bf16.mxu1 %vm4520_vm0, %v4519_v4 }
 0xa3f   : > { %v2231_v6 = vpop.permute.xlu1 %2230  ;;  %v2226_v10 = vpop.permute.xlu0 %2225 }
 0xa40   : > { %v2340_v0 = vsel %vm1370_vm1, %v2231_v6, 0 }
 0xa41   : > { %3724 = vmatpush3.bf16.xpose.msra.mxu1 %v2340_v0 }
 0xa42   : > { %3729 = vmatprep.subr.bf16.mxu1 %v4519_v4 }
 0xa43   : > { %v2233_v7 = vpop.permute.xlu1 %2232 }
 0xa44   : > { %v2386_v9 = vsel %vm1370_vm1, %v2233_v7, 0 }
 0xa48   : > { %3726 = vmatmul.mubr.msk.bf16.vlgmr.msra.gmra.mxu1 %vm1370_vm1, %v2224_v8 }
 0xa49   : > { %3730 = vmatpush3.bf16.xpose.msra.mxu1 %v2386_v9  ;;  %3731 = vmatprep.mubr.msk.bf16.mxu1 %vm4520_vm0, %v4519_v4 }
 0xa4a   : > { %3741 = vmatprep.subr.bf16.mxu1 %v4519_v4 }
 0xa50   : > { %3732 = vmatmul.mubr.msk.bf16.vlgmr.msra.gmra.mxu1 %vm1370_vm1, %v2226_v10 }
 0xa51   : > { %3743 = vmatprep.mubr.msk.bf16.mxu1 %vm4520_vm0, %v4519_v4 }
 0xa8a   : > { %v2284_v59 = vpop.f32.mrf.mxu1 }
 0xa8b   : > { %v2431_v12 = vsel %vm2428_vm7, -1e+30, %v2284_v59 }
 0xa8c   : > { %v3715_v13 = vpop.f32.mrf.mxu1  ;;  %v2436_v14 = vsel %vm2435_vm8, %v2431_v12, -inf }
 0xa8d   : > { %2437 = vmax.xlane.f32.xlu1 %v2436_v14 }
 0xa8e   : > { %v2287_v15 = vpop.f32.mrf.mxu1 }
 0xa90   : > { %v3716_v16 = vpop.f32.mrf.mxu1 }
 0xafc   : > { %v2330_v17 = vpop.f32.mrf.mxu1 }
 0xafd   : > { %v2432_v18 = vsel %vm2428_vm7, -1e+30, %v2330_v17 }
 0xafe   : > { %v3721_v20 = vpop.f32.mrf.mxu1  ;;  %v2439_v21 = vsel %vm2435_vm8, %v2432_v18, -inf }
 0xaff   : > { %2440 = vmax.xlane.f32.xlu0 %v2439_v21  ;;  %v4003_v20 = vld [vmem:[#allocation17 + $0x38] sm:$0xff]  }
 0xb00   : > { %v2333_v22 = vpop.f32.mrf.mxu1 }
 0xb01   : > { %v4004_v22 = vld [vmem:[#allocation17 + $0x30] sm:$0xff]  }
 0xb02   : > { %v3722_v23 = vpop.f32.mrf.mxu1 }
 0xb08   : > { %v2376_v24 = vpop.f32.mrf.mxu1 }
 0xb09   : > { %v2433_v25 = vsel %vm2428_vm7, -1e+30, %v2376_v24 }
 0xb0a   : > { %v3727_v26 = vpop.f32.mrf.mxu1  ;;  %v2442_v27 = vsel %vm2435_vm8, %v2433_v25, -inf }
 0xb0b   : > { %2443 = vmax.xlane.f32.xlu0 %v2442_v27 }
 0xb0c   : > { %v2379_v28 = vpop.f32.mrf.mxu1 }
 0xb0e   : > { %v3728_v29 = vpop.f32.mrf.mxu1 }
 0xb0f   : > { %v4007_v29 = vld [vmem:[#allocation17 + $0x18] sm:$0xff]  }
 0xb10   : > { %v2422_v30 = vpop.f32.mrf.mxu1 }
 0xb11   : > { %v2434_v31 = vsel %vm2428_vm7, -1e+30, %v2422_v30 }
 0xb12   : > { %v3733_v32 = vpop.f32.mrf.mxu1  ;;  %v2445_v33 = vsel %vm2435_vm8, %v2434_v31, -inf }
 0xb13   : > { %2446 = vmax.xlane.f32.xlu1 %v2445_v33  ;;  %v4008_v32 = vld [vmem:[#allocation17 + $0x10] sm:$0xff]   ;;  %v4009_v33 = vld [vmem:[#allocation17 + $0x8] sm:$0xff]  }
 0xb14   : > { %v2425_v34 = vpop.f32.mrf.mxu1 }
 0xb15   : > { %v4010_v34 = vld [vmem:[#allocation17] sm:$0xff]  }
 0xb16   : > { %v2438_v35 = vpop.xlane.xlu1 %2437  ;;  %v3734_v36 = vpop.f32.mrf.mxu1 }
 0xb17   : > { %v2448_v37 = vsub.f32 %v2431_v12, %v2438_v35 }
 0xb19   : > { %v2452_v38 = vmul.f32 1.442695, %v2448_v37 }
 0xb1b   : > { %4071 = vpow2.f32 %v2452_v38 }
 0xb28   : > { %v4072_v39 = vpop.eup %4071 }
 0xb29   : > { %v2460_v40 = vsel %vm2435_vm8, %v4072_v39, 0.0 }
 0xb2a   : > { %2461 = vadd.xlane.f32.xlu0 %v2460_v40 }
 0xb88   : > { %v2441_v41 = vpop.xlane.xlu0 %2440 }
 0xb89   : > { %v2449_v42 = vsub.f32 %v2432_v18, %v2441_v41 }
 0xb8b   : > { %v2454_v44 = vmul.f32 1.442695, %v2449_v42 }
 0xb8d   : > { %4073 = vpow2.f32 %v2454_v44 }
 0xb94   : > { %v2444_v46 = vpop.xlane.xlu0 %2443 }
 0xb95   : > { %v2450_v47 = vsub.f32 %v2433_v25, %v2444_v46  ;;  %v4005_v25 = vld [vmem:[#allocation17 + $0x28] sm:$0xff]  }
 0xb97   : > { %v2456_v48 = vmul.f32 1.442695, %v2450_v47 }
 0xb99   : > { %4075 = vpow2.f32 %v2456_v48 }
 0xb9a   : > { %v4074_v49 = vpop.eup %4073 }
 0xb9b   : > { %v2463_v50 = vsel %vm2435_vm8, %v4074_v49, 0.0 }
 0xb9c   : > { %2464 = vadd.xlane.f32.xlu1 %v2463_v50  ;;  %v2447_v55 = vpop.xlane.xlu1 %2446 }
 0xb9d   : > { %v2451_v56 = vsub.f32 %v2434_v31, %v2447_v55  ;;  %v4011_v55 = vld [vmem:[#allocation19 + $0x70] ss:$8 sps:$4 sm:$0xff]  }
 0xb9f   : > { %v2458_v57 = vmul.f32 1.442695, %v2451_v56  ;;  %v4013_v56 = vld [vmem:[#allocation19 + $0x74] ss:$8 sps:$4 sm:$0xff]  }
 0xba6   : > { %v4076_v51 = vpop.eup %4075 }
 0xba7   : > { %v2466_v52 = vsel %vm2435_vm8, %v4076_v51, 0.0 }
 0xba8   : > { %2467 = vadd.xlane.f32.xlu0 %v2466_v52 }
 0xbad   : > { %2238 = vrot.lane.b32.xlu1 %v5155_v54, %s4522_s30 }
 0xbb3   : > { %v2462_v53 = vpop.xlane.xlu0 %2461 }
 0xbb4   : > { %4077 = vrcp.f32 %v2462_v53 }
 0xbb5   : > { %4079 = vpow2.f32 %v2458_v57  ;;  %v4016_v57 = vld [vmem:[#allocation19 + $0x64] ss:$8 sps:$4 sm:$0xff]  }
 0xbbe   : > { %2235 = vrot.lane.b32.xlu0 %v5155_v54, %s4523_s18 }
 0xbc1   : > { %v4078_v60 = vpop.eup %4077 }
 0xbc2   : > { %v2476_v61 = vmul.f32 %v4078_v60, %v4072_v39  ;;  %v4080_v63 = vpop.eup %4079  ;;  %v4014_v60 = vld [vmem:[#allocation19 + $0x60] ss:$8 sps:$4 sm:$0xff]  }
 0xbc3   : > { %v2469_v1 = vsel %vm2435_vm8, %v4080_v63, 0.0 }
 0xbc4   : > { %v2480_v62 = vpack.c.bf16 %v2476_v61, %v2476_v61 }
 0xbc6   : > { %3738 = vmatmul.mubr.msk.bf16.vlgmr.msra.gmra.mxu0 %vm2435_vm8, %v2480_v62 }
 0xbc7   : > { %3749 = vmatprep.mubr.msk.bf16.mxu0 %vm4520_vm0, %v4519_v4 }
 0xbd1   : > { %2470 = vadd.xlane.f32.xlu1 %v2469_v1 }
 0xbe2   : > { %2241 = vrot.lane.b32.xlu1 %v5155_v54, %s4524_s10 }
 0xc25   : > { %v2465_v2 = vpop.xlane.xlu1 %2464 }
 0xc26   : > { %4081 = vrcp.f32 %v2465_v2  ;;  %v4017_v2 = vld [vmem:[#allocation19 + $0x50] ss:$8 sps:$4 sm:$0xff]  }
 0xc29   : > { %v2239_v3 = vpop.permute.xlu1 %2238 }
 0xc2a   : > { %3748 = vmatpush3.bf16.msra.mxu0 %v2239_v3  ;;  %v4020_v3 = vld [vmem:[#allocation19 + $0x40] ss:$8 sps:$4 sm:$0xff]  }
 0xc2b   : > { %3759 = vmatprep.subr.bf16.mxu0 %v4519_v4 }
 0xc31   : > { %v2468_v5 = vpop.xlane.xlu0 %2467 }
 0xc32   : > { %4083 = vrcp.f32 %v2468_v5  ;;  %v4022_v5 = vld [vmem:[#allocation19 + $0x44] ss:$8 sps:$4 sm:$0xff]  }
 0xc33   : > { %v4082_v6 = vpop.eup %4081 }
 0xc34   : > { %v2477_v0 = vmul.f32 %v4082_v6, %v4074_v49  ;;  %v4025_v6 = vld [vmem:[#allocation19 + $0x34] ss:$8 sps:$4 sm:$0xff]  }
 0xc35   : > { %v2236_v7 = vpop.permute.xlu0 %2235 }
 0xc36   : > { %3742 = vmatpush3.bf16.msra.mxu1 %v2236_v7  ;;  %v2481_v8 = vpack.c.bf16 %v2477_v0, %v2477_v0  ;;  %v4023_v0 = vld [vmem:[#allocation19 + $0x30] ss:$8 sps:$4 sm:$0xff]   ;;  %v4028_v7 = vld [vmem:[#allocation19 + $0x24] ss:$8 sps:$4 sm:$0xff]  }
 0xc37   : > { %3753 = vmatprep.subr.bf16.mxu1 %v4519_v4 }
 0xc39   : > { %3744 = vmatmul.mubr.msk.bf16.vlgmr.msra.gmra.mxu1 %vm2435_vm8, %v2481_v8  ;;  %v4026_v8 = vld [vmem:[#allocation19 + $0x20] ss:$8 sps:$4 sm:$0xff]  }
 0xc3a   : > { %3755 = vmatprep.mubr.msk.bf16.mxu1 %vm4520_vm0, %v4519_v4 }
 0xc3f   : > { %v4084_v54 = vpop.eup %4083 }
 0xc40   : > { %v2478_v9 = vmul.f32 %v4084_v54, %v4076_v51  ;;  %v4031_v54 = vld [vmem:[#allocation19 + $0x14] ss:$8 sps:$4 sm:$0xff]  }
 0xc42   : > { %v2482_v10 = vpack.c.bf16 %v2478_v9, %v2478_v9  ;;  %v4029_v9 = vld [vmem:[#allocation19 + $0x10] ss:$8 sps:$4 sm:$0xff]  }
 0xc44   : > { %3750 = vmatmul.mubr.msk.bf16.vlgmr.msra.gmra.mxu0 %vm2435_vm8, %v2482_v10  ;;  %v4034_v10 = vld [vmem:[#allocation19 + $0x4] ss:$8 sps:$4 sm:$0xff]  }
 0xc45   : > { %3775 = vmatprep.mubr.msk.bf16.mxu0 %vm4520_vm0, %v4519_v4  ;;  %3760 = vmatpush3.bf16.msra.mxu0 %v4003_v20  ;;  %v4043_v20 = vld [vmem:[#allocation20 + $0x58] sm:$0xff]  }
 0xc46   : > { %3761 = vmatprep.subr.bf16.mxu0 %v4519_v4 }
 0xc49   : > { %3762 = vmatpush3.bf16.msra.mxu0 %v4004_v22  ;;  %v4045_v22 = vld [vmem:[#allocation20 + $0x50] sm:$0xff]  }
 0xc4a   : > { %3763 = vmatprep.subr.bf16.mxu0 %v4519_v4 }
 0xc4d   : > { %3764 = vmatpush3.bf16.msra.mxu0 %v4005_v25 }
 0xc4e   : > { %3765 = vmatprep.subr.bf16.mxu0 %v4519_v4 }
 0xc5a   : > { %v2471_v11 = vpop.xlane.xlu1 %2470 }
 0xc5b   : > { %4085 = vrcp.f32 %v2471_v11  ;;  %v4032_v11 = vld [vmem:[#allocation19] ss:$8 sps:$4 sm:$0xff]  }
 0xc5e   : > { %v2242_v59 = vpop.permute.xlu1 %2241 }
 0xc5f   : > { %3754 = vmatpush3.bf16.msra.mxu1 %v2242_v59  ;;  %v4035_v59 = vld [vmem:[#allocation20 + $0x78] sm:$0xff]  }
 0xc60   : > { %2903 = vmatprep.subr.bf16.mxu1 %v4013_v56 }
 0xc68   : > { %v4086_v12 = vpop.eup %4085 }
 0xc69   : > { %v2479_v13 = vmul.f32 %v4086_v12, %v4080_v63  ;;  %v4036_v12 = vld [vmem:[#allocation20 + $0x38] sm:$0xff]  }
 0xc6b   : > { %v2483_v14 = vpack.c.bf16 %v2479_v13, %v2479_v13  ;;  %v4037_v13 = vld [vmem:[#allocation20 + $0x70] sm:$0xff]  }
 0xc6d   : > { %3756 = vmatmul.mubr.msk.bf16.vlgmr.msra.gmra.mxu1 %vm2435_vm8, %v2483_v14  ;;  %v4038_v14 = vld [vmem:[#allocation20 + $0x30] sm:$0xff]  }
 0xc6e   : > { %2935 = vmatprep.mubr.bf16.mxu1 %v4521_v19  ;;  %v4006_v19 = vld [vmem:[#allocation17 + $0x20] sm:$0xff]   ;;  %2904 = vmatpush1.bf16.msra.mxu1 %v4011_v55 }
 0xc6f   : > { %3766 = vmatpush3.bf16.msra.mxu0 %v4006_v19  ;;  %2905 = vmatprep.subr.bf16.mxu1 %v4016_v57 }
 0xc70   : > { %3767 = vmatprep.subr.bf16.mxu0 %v4519_v4 }
 0xc72   : > { %2906 = vmatpush1.bf16.msra.mxu1 %v4014_v60 }
 0xc73   : > { %3768 = vmatpush3.bf16.msra.mxu0 %v4007_v29  ;;  %v3474_v29 = vld [vmem:[%s5422_s19] ss:$0 sm:$0xff]  ;;  %s4525_s19 = smov [#allocation22]  }
 0xc74   : > { %3769 = vmatprep.subr.bf16.mxu0 %v4519_v4  ;;  %s4413_s29 = sshll.u32 %s4525_s19, 4  ;;  %s4414_s29 = int_to_ptr.vmem [resolvable:$false] %s4413_s29 }
 0xc75   : > { %s4415_s2 = scalar_lea.vmem %s4414_s29, 256  ;;  %p4416_p9 = scmp.lt.s32.totalorder %s3140_s26, %s4414_s29 }
 0xc77   : > { %3770 = vmatpush3.bf16.msra.mxu0 %v4008_v32 }
 0xc78   : > { %3771 = vmatprep.subr.bf16.mxu0 %v4519_v4 }
 0xc7b   : > { %3772 = vmatpush3.bf16.msra.mxu0 %v4009_v33  ;;  %v4047_v33 = vld [vmem:[#allocation20 + $0x48] sm:$0xff]  }
 0xc7c   : > { %3773 = vmatprep.subr.bf16.mxu0 %v4519_v4  ;;  %v3464_v4 = vld [vmem:[%s5420_s25] ss:$0 sm:$0xff] }
 0xc7f   : > { %3774 = vmatpush3.bf16.msra.mxu0 %v4010_v34  ;;  %v4048_v34 = vld [vmem:[#allocation20 + $0x8] sm:$0xff]  }
 0xc80   : > { %3581 = vmatprep.subr.bf16.mxu0 %v4035_v59 }
 0xc86   : > { %v2521_v15 = vpop.f32.mrf.mxu0 }
 0xc88   : > { %v3739_v16 = vpop.f32.mrf.mxu0 }
 0xc89   : > { %v4040_v16 = vld [vmem:[#allocation20 + $0x28] sm:$0xff]  }
 0xc8a   : > { %v2524_v17 = vpop.f32.mrf.mxu0 }
 0xc8b   : > { %v4041_v17 = vld [vmem:[#allocation20 + $0x60] sm:$0xff]  }
 0xc8c   : > { %v3740_v18 = vpop.f32.mrf.mxu0 }
 0xc8d   : > { %v4042_v18 = vld [vmem:[#allocation20 + $0x20] sm:$0xff]  }
 0xcf9   : > { %v2564_v21 = vpop.f32.mrf.mxu1 }
 0xcfa   : > { %2657 = vrot.lane.b32.xlu0 %v2564_v21, %s4524_s10  ;;  %v4044_v21 = vld [vmem:[#allocation20 + $0x18] sm:$0xff]   ;;  %s4409_s10 = scalar_lea.vmem %s3140_s26, 128 }
 0xcfb   : > { %v3745_v23 = vpop.f32.mrf.mxu1  ;;  %p4410_p1 = scmp.ne.s32.totalorder %s3140_s26, %s4409_s10  ;;  %p4417_p6 = scmp.lt.s32.totalorder %s4415_s2, %s4409_s10 }
 0xcfc   : > { %v4046_v23 = vld [vmem:[#allocation20 + $0x10] sm:$0xff]  }
 0xcfd   : > { %v2567_v24 = vpop.f32.mrf.mxu1  ;;  %p4411_p7 = pnand %p4410_p1, %p5428_p4  ;;  %p4418_p0 = por %p4417_p6, %p4416_p9 }
 0xcff   : > { %v3746_v26 = vpop.f32.mrf.mxu1  ;;  %p4412_p11 = pneg %p4411_p7 }
 0xd01   : > { %p4419_p13 = pnand %p4418_p0, %p4412_p11 }
 0xd04   : > { %v2607_v27 = vpop.f32.mrf.mxu0 }
 0xd05   : > { %2661 = vrot.lane.b32.xlu1 %v2607_v27, %s4522_s30  ;;  %s5421_s30 = sld [smem:[#allocation53_spill]] }
 0xd06   : > { %v3751_v28 = vpop.f32.mrf.mxu0 }
 0xd08   : > { %v2610_v30 = vpop.f32.mrf.mxu0 }
 0xd0a   : > { %v3752_v31 = vpop.f32.mrf.mxu0 }
 0xd0b   : > { %v3473_v27 = vld [vmem:[%s5421_s30] ss:$0 sm:$0xff]  ;;  %s3137_s30 = scalar_lea.hbm %s5426_s7, %s3509_s8 }
 0xd2d   : > { %v2650_v35 = vpop.f32.mrf.mxu1 }
 0xd2e   : > { %2665 = vrot.lane.b32.xlu0 %v2650_v35, %s4523_s18  ;;  %v4049_v35 = vld [vmem:[#allocation20 + $0x40] sm:$0xff]   ;;  %s3126_s18 = scalar_lea.sflag [#allocation4], %s4954_s27 }
 0xd2f   : > { %v3757_v36 = vpop.f32.mrf.mxu1 }
 0xd30   : > { %v4050_v36 = vld [vmem:[#allocation20] sm:$0xff]  }
 0xd31   : > { %v2653_v37 = vpop.f32.mrf.mxu1 }
 0xd32   : > { %v2811_v37 = vld [vmem:[%s5423_s5] sm:$0x3] }
 0xd33   : > { %v3758_v38 = vpop.f32.mrf.mxu1 }
 0xd34   : > { %v2816_v38 = vrot.slane %v2811_v37, %v5026_v43  ;;  %v3491_v43 = vld [vmem:[%s5424_s23] ss:$0 sm:$0xff] }
 0xd6c   : > { %v2658_v39 = vpop.permute.xlu0 %2657 }
 0xd6d   : > { %v2668_v41 = vsel %vm1370_vm1, %v2521_v15, %v2658_v39  ;;  %v4039_v15 = vld [vmem:[#allocation20 + $0x68] sm:$0xff]   ;;  %v2820_v39 = vrot.slane %v2811_v37, %v5031_v45 }
 0xd77   : > { %v2662_v40 = vpop.permute.xlu1 %2661 }
 0xd78   : > { %v2669_v42 = vsel %vm1809_vm5, %v2668_v41, %v2662_v40 }
 0xda0   : > { %v2666_v44 = vpop.permute.xlu0 %2665 }
 0xda1   : > { %v2670_v46 = vsel %vm1811_vm6, %v2669_v42, %v2666_v44 }
 0xda2   : > { %v2671_v47 = vpack.c.bf16 %v2670_v46, %v2670_v46 }
 0xda4   : > { %3776 = vmatmul.mubr.bf16.vlgmr.msra.gmra.mxu0 %v2671_v47 }
 0xda5   : > { %3582 = vmatpush3.bf16.msra.mxu0 %v4036_v12 }
 0xda6   : > { %3583 = vmatprep.subr.bf16.mxu0 %v4037_v13 }
 0xda9   : > { %3584 = vmatpush3.bf16.msra.mxu0 %v4038_v14 }
 0xdaa   : > { %3585 = vmatprep.subr.bf16.mxu0 %v4039_v15 }
 0xdad   : > { %3586 = vmatpush3.bf16.msra.mxu0 %v4040_v16 }
 0xdae   : > { %3587 = vmatprep.subr.bf16.mxu0 %v4041_v17 }
 0xdb1   : > { %3588 = vmatpush3.bf16.msra.mxu0 %v4042_v18 }
 0xdb2   : > { %3589 = vmatprep.subr.bf16.mxu0 %v4043_v20 }
 0xdb5   : > { %3590 = vmatpush3.bf16.msra.mxu0 %v4044_v21 }
 0xdb6   : > { %3591 = vmatprep.subr.bf16.mxu0 %v4045_v22 }
 0xdb9   : > { %3592 = vmatpush3.bf16.msra.mxu0 %v4046_v23 }
 0xdba   : > { %3593 = vmatprep.subr.bf16.mxu0 %v4047_v33 }
 0xdbd   : > { %3594 = vmatpush3.bf16.msra.mxu0 %v4048_v34 }
 0xdbe   : > { %3595 = vmatprep.subr.bf16.mxu0 %v4049_v35 }
 0xdc1   : > { %3596 = vmatpush3.bf16.msra.mxu0 %v4050_v36 }
 0xe64   : > { %v2760_v48 = vpop.f32.mrf.mxu0 }
 0xe65   : > { %v2761_v49 = vadd.f32 %v3464_v4, %v2760_v48 }
 0xe66   : > { %v3777_v50 = vpop.f32.mrf.mxu0 }
 0xe67   : > { %v5238_v51 = vadd.f32 %v2761_v49, %v5125_v58  ;;  %v4019_v58 = vld [vmem:[#allocation19 + $0x54] ss:$8 sps:$4 sm:$0xff]  }
 0xe68   : > { %v2763_v52 = vpop.f32.mrf.mxu0  ;;  %2907 = vmatprep.subr.bf16.mxu1 %v4019_v58 }
 0xe69   : > { %2769 = vadd.xlane.f32.xlu1 %v5238_v51  ;;  %2908 = vmatpush1.bf16.msra.mxu1 %v4017_v2 }
 0xe6a   : > { %v3778_v53 = vpop.f32.mrf.mxu0  ;;  %2909 = vmatprep.subr.bf16.mxu1 %v4022_v5 }
 0xe6d   : > { %2910 = vmatpush1.bf16.msra.mxu1 %v4020_v3 }
 0xe6e   : > { %2911 = vmatprep.subr.bf16.mxu1 %v4025_v6 }
 0xe71   : > { %2912 = vmatpush1.bf16.msra.mxu1 %v4023_v0 }
 0xe72   : > { %2913 = vmatprep.subr.bf16.mxu1 %v4028_v7 }
 0xe75   : > { %2914 = vmatpush1.bf16.msra.mxu1 %v4026_v8 }
 0xe76   : > { %2915 = vmatprep.subr.bf16.mxu1 %v4031_v54 }
 0xe79   : > { %2916 = vmatpush1.bf16.msra.mxu1 %v4029_v9 }
 0xe7a   : > { %2917 = vmatprep.subr.bf16.mxu1 %v4034_v10 }
 0xe7d   : > { %2918 = vmatpush1.bf16.msra.mxu1 %v4032_v11 }
 0xef2   : > { %v2770_v61 = vpop.xlane.xlu1 %2769 }
 0xef3   : > { %v2771_v62 = vmul.f32 0.0078125, %v2770_v61 }
 0xef5   : > { %v2772_v63 = vsub.f32 %v5238_v51, %v2771_v62 }
 0xef7   : > { %v2773_v1 = vmul.f32 %v2772_v63, %v2772_v63 }
 0xef9   : > { %2774 = vadd.xlane.f32.xlu0 %v2773_v1 }
 0xf82   : > { %v2775_v24 = vpop.xlane.xlu0 %2774 }
 0xf83   : > { %v2776_v25 = vmul.f32 0.0078125, %v2775_v24 }
 0xf85   : > { %v2777_v26 = vadd.f32 1e-05, %v2776_v25 }
 0xf87   : > { %4087 = vrsqrt.f32 %v2777_v26 }
 0xf94   : > { %v4088_v19 = vpop.eup %4087 }
 0xf95   : > { %v2779_v28 = vmul.f32 %v4088_v19, %v2772_v63 }
 0xf97   : > { %v2786_v30 = vmul.f32 %v3473_v27, %v2779_v28 }
 0xf99   : > { %v2793_v31 = vadd.f32 %v3474_v29, %v2786_v30 }
 0xf9b   : > { %v2794_v32 = vpack.c.bf16 %v2793_v31, %v2793_v31 }
 0xf9d   : > { %2936 = vmatmul.mubr.bf16.vlgmr.msra.gmra.mxu1 %v2794_v32 }
0x105d   : > { %v2937_v40 = vpop.f32.mrf.mxu1 }
0x105e   : > { %v2938_v41 = vadd.f32 %v2937_v40, %v2816_v38 }
0x105f   : > { %v2939_v42 = vpop.f32.mrf.mxu1 }
0x1060   : > { %v2940_v44 = vadd.f32 %v2939_v42, %v2820_v39  ;;  %v2944_v46 = vmax.f32 %v2938_v41, 0.0 }
0x1061   : > { %v2941_v47 = vpop.f32.mrf.mxu1 }
0x1062   : > { %v2945_v4 = vmax.f32 %v2940_v44, 0.0  ;;  %v2946_v50 = vpack.c.bf16 %v2944_v46, %v2944_v46 }
0x1063   : > { %v2942_v48 = vpop.f32.mrf.mxu1 }
0x1064   : > { %v2947_v49 = vpack.c.bf16 %v2945_v4, %v2945_v4 }
0x1066   : > { %3115 = vmatprep.mubr.bf16.mxu0 %v2947_v49 }
0x1067   : > { %3116 = vmatmul.mubr.bf16.vlgmr.msra.gmra.mxu0 %v2946_v50 }
0x1127   : > { %v3597_v52 = vpop.f32.mrf.mxu0 }
0x1129   : > { %v3598_v45 = vpop.f32.mrf.mxu0 }
0x112a   : > { %v3599_v53 = vadd.f32 %v3598_v45, %v3597_v52 }
0x112b   : > { %v3600_v55 = vpop.f32.mrf.mxu0 }
0x112c   : > { %v3118_v56 = vadd.f32 %v3599_v53, %v3491_v43 }
0x112d   : > { %v3601_v57 = vpop.f32.mrf.mxu0 }
0x112e   : > { %v3123_v60 = vadd.f32 %v3118_v56, %v5238_v51 }
0x1130   : > { %3124 = vst [vmem:[%s1033_s4] sm:$0xff] %v3123_v60 }
0x1131   : > { %4422 = shalt.err (!%p4419_p13)
}
0x1132   : > { %s4423_s20 = scalar_lea.hbm %s3137_s30, 128  ;;  %s4427_s5 = scalar_lea.hbm %s5427_s0, 256 }
0x1133   : > { %p4424_p8 = scmp.ne.s32.totalorder %s3137_s30, %s4423_s20  ;;  %p4428_p5 = scmp.lt.s32.totalorder %s3137_s30, %s5427_s0 }
0x1134   : > { %p4429_p10 = scmp.lt.s32.totalorder %s4427_s5, %s4423_s20 }
0x1135   : > { %p4425_p2 = pnand %p4424_p8, %p5428_p4 }
0x1136   : > { %p4430_p12 = por %p4429_p10, %p4428_p5 }
0x1137   : > { %p4426_p3 = pneg %p4425_p2 }
0x1139   : > { %p4431_p1 = pnand %p4430_p12, %p4426_p3 }
0x113b   : > { %4434 = shalt.err (!%p4431_p1)
}
0x113c   : > { %3819 = dma.vmem_to_hbm [thread:$0]  (%p5428_p4), %s3140_s26, 128, %s3137_s30, %s3126_s18  }
0x113d PF: > { %s5429_s23 = sld [smem:[#allocation32_spill]]  ;;  %p5432_p11 = scmp.ge.s32.totalorder %s4501_s28, 2 }
0x113e   : > { %s5430_s8 = sld [smem:[#allocation37_spill]] }
0x1143   : > { %s3151_s4 = sand.u32 1, %s5429_s23  }
0x1144   : > { %p5431_p7 = scmp.ne.s32.totalorder %s5430_s8, 0  ;;  %s3152_s22 = scalar_lea.sflag [#allocation4], %s3151_s4 }
0x1146   : > { %p3860_p9 = pnand %p5432_p11, %p5431_p7 }
0x1148   : > { %p3861_p6 = pneg %p3860_p9 }
0x114a   : > { %4484 = dma.done.wait (%p3861_p6), %s3152_s22, 128  }
0x114b   : > { %4486 = vsyncadd (%p3861_p6), %s3152_s22, 4294967168  ;;  %s5433_s28 = sld [smem:[#allocation34_spill]]  ;;  %s5436_s27 = smov %s4493_s3 }
0x114c   : > { %s5434_s25 = sld [smem:[#allocation33_spill]] }
0x114d   : > { %s5435_s7 = sld [smem:[#allocation35_spill]] }
0x1151   : > { %p49_p0 = scmp.ge.s32.totalorder %s5433_s28, 4  }
0x1152   : > { %s5437_s3 = smov %s5434_s25 }
0x1153   :  { %51 = sbr.rel (!%p49_p0) target bundleno = 35 (0x23), region = 238 }
0x1158   :  { %3157 = vsyncpa [#allocation3], 1 }
0x1159   :  { %3159 = vsyncpa [#allocation3 + $0x1], 1 }
0x115a   :  { %3160 = vsyncpa [#allocation6], 1 }
0x115b   :  { %3162 = vsyncpa [#allocation6 + $0x1], 1 }
0x115c   :  { %3163 = vsyncpa [#allocation9], 1 }
0x115d   :  { %3165 = vsyncpa [#allocation9 + $0x1], 1 }
0x115e   :  { %3166 = vsyncpa [#allocation12], 1 }
0x115f   :  { %3167 = vsyncpa [#allocation15], 1 }
0x1160   :  { %3168 = vsyncpa [#allocation18], 1 }
0x1161   :  { %3169 = vsyncpa [#allocation21], 1 }
0x1162   :  { %3170 = vsyncpa [#allocation4], 1 }
0x1163   :  { %3172 = vsyncpa [#allocation4 + $0x1], 1 }

</bundles_post_ra>
